<compile_context>
chip_gen: v7x
topology: tpu7x:2x2x1
jax: 0.10.0
libtpu: 0.0.40
codegen_flags: <defaults>
</compile_context>

<pallas_src>
import jax
import jax.numpy as jnp
from jax.experimental import pallas as pl

# ----- small synthetic config (BERT-base would be H=768, 12 layers, 12 heads) -----
VOCAB = 100
HIDDEN = 32
SEQ = 8
BATCH = 2
N_LAYERS = 2
N_HEADS = 2
HEAD_DIM = HIDDEN // N_HEADS
FFN = 128
N_CLASSES = 3
EPS = 1e-12  # BERT layernorm eps

# rows of the packed per-layer "small params" array ([N_LAYERS, 6, HIDDEN])
_ROW_BO, _ROW_B2, _ROW_LN1G, _ROW_LN1B, _ROW_LN2G, _ROW_LN2B = range(6)


def _layernorm(x, gamma, beta):
    mu = jnp.mean(x, axis=-1, keepdims=True)
    var = jnp.mean(jnp.square(x - mu), axis=-1, keepdims=True)
    return (x - mu) * jax.lax.rsqrt(var + EPS) * gamma + beta


def _gelu(x):
    # tanh approximation of GELU (BERT / torch nn.GELU default is erf-based; numerically very close)
    c = 0.7978845608028654  # sqrt(2/pi)
    return 0.5 * x * (1.0 + jnp.tanh(c * (x + 0.044715 * x * x * x)))


# ---------------- fused Pallas kernel: emb-LN -> N encoder layers -> mean pool -> heads --------
def fused_forward_kernel(x_ref, mask_ref, embln_ref,
                         wqkv_ref, bqkv_ref, wo_ref,
                         w1_ref, b1_ref, w2_ref, small_ref,
                         whead_ref, bhead_ref,
                         logits_ref):
    B, S, H, D = BATCH, SEQ, HIDDEN, HEAD_DIM

    # Hoisted once: (B, 1, S) -> (B, S, S). JAX does not CSE broadcast_in_dim, so doing this
    # inside the (unrolled) layer/head loops would re-emit it N_LAYERS * N_HEADS times.
    add_mask = jnp.broadcast_to(mask_ref[...], (B, S, S))

    # embedding layernorm (per-token over H), on the flattened (B*S, H) slab
    x = _layernorm(x_ref[...].reshape(B * S, H), embln_ref[0:1, :], embln_ref[1:2, :])

    scale = 1.0 / (D ** 0.5)

    # TODO(synk): at BERT depth (12 layers) replace this static unroll with lax.fori_loop or a
    # grid axis over layers with streamed/Buffered per-layer weights; fine at N_LAYERS=2.
    for l in range(N_LAYERS):
        small = small_ref[l]                                   # (6, H) bo|b2|ln1g|ln1b|ln2g|ln2b
        bo = small[_ROW_BO:_ROW_BO + 1, :]
        b2 = small[_ROW_B2:_ROW_B2 + 1, :]
        ln1g = small[_ROW_LN1G:_ROW_LN1G + 1, :]
        ln1b = small[_ROW_LN1B:_ROW_LN1B + 1, :]
        ln2g = small[_ROW_LN2G:_ROW_LN2G + 1, :]
        ln2b = small[_ROW_LN2B:_ROW_LN2B + 1, :]

        xb = x.astype(jnp.bfloat16)                            # bf16 MXU operand, f32 accumulate

        # Per-head attention. Weights are pre-split per head on leading (free) dims, so there is
        # no intra-vreg lane slicing of a fused QKV result; the per-head output projection is
        # folded in (attn_out += ctx_h @ Wo_h), so there is no lane concat and no VMEM scratch.
        attn_out = jnp.zeros((B * S, H), jnp.float32)
        for h in range(N_HEADS):                               # static loop, N_HEADS == 2
            qh = (jnp.dot(xb, wqkv_ref[l, 0 * N_HEADS + h],
                          preferred_element_type=jnp.float32)
                  + bqkv_ref[l, 0 * N_HEADS + h]).reshape(B, S, D)
            kh = (jnp.dot(xb, wqkv_ref[l, 1 * N_HEADS + h],
                          preferred_element_type=jnp.float32)
                  + bqkv_ref[l, 1 * N_HEADS + h]).reshape(B, S, D)
            vh = (jnp.dot(xb, wqkv_ref[l, 2 * N_HEADS + h],
                          preferred_element_type=jnp.float32)
                  + bqkv_ref[l, 2 * N_HEADS + h]).reshape(B, S, D)

            s = jnp.einsum('bqd,bkd->bqk',
                           qh.astype(jnp.bfloat16), kh.astype(jnp.bfloat16),
                           preferred_element_type=jnp.float32) * scale + add_mask
            s = s - jnp.max(s, axis=-1, keepdims=True)
            p = jnp.exp(s)
            p = p * pl.reciprocal(jnp.sum(p, axis=-1, keepdims=True), approx=True)

            ctx_h = jnp.einsum('bqk,bkd->bqd',
                               p.astype(jnp.bfloat16), vh.astype(jnp.bfloat16),
                               preferred_element_type=jnp.float32).reshape(B * S, D)
            attn_out = attn_out + jnp.dot(ctx_h.astype(jnp.bfloat16), wo_ref[l, h],
                                          preferred_element_type=jnp.float32)

        h1 = _layernorm(x + attn_out + bo, ln1g, ln1b)

        ff = _gelu(jnp.dot(h1.astype(jnp.bfloat16), w1_ref[l],
                           preferred_element_type=jnp.float32) + b1_ref[l])
        ff = jnp.dot(ff.astype(jnp.bfloat16), w2_ref[l],
                     preferred_element_type=jnp.float32) + b2
        x = _layernorm(h1 + ff, ln2g, ln2b)

    # mean pooling over seq (plain mean, like torch `.mean(dim=1)` — mask NOT used for pooling)
    emb = jnp.mean(x.reshape(B, S, H), axis=1)                 # (B, H)

    # both heads fused into one (H, 2*N_CLASSES) matmul; split back in the wrapper
    logits_ref[...] = (jnp.dot(emb.astype(jnp.bfloat16), whead_ref[...],
                               preferred_element_type=jnp.float32) + bhead_ref[...])


def fused_forward(x_emb, add_mask, params):
    # TODO(synk): on v7x / at real batch sizes add a grid axis over batch with
    # dimension_semantics=("parallel",) to use both TensorCores; grid-less is right at B=2.
    logits = pl.pallas_call(
        fused_forward_kernel,
        out_shape=jax.ShapeDtypeStruct((BATCH, 2 * N_CLASSES), jnp.float32),
    )(x_emb, add_mask, params["emb_ln"],
      params["wqkv"], params["bqkv"], params["wo"],
      params["w1"], params["b1"], params["w2"], params["smalls"],
      params["head_w"], params["head_b"])
    return logits[:, :N_CLASSES], logits[:, N_CLASSES:]


# ---------------- parameters (deterministic synthetic init; no checkpoint loading) -------------
def init_params(key):
    keys = iter(jax.random.split(key, 16))

    def rnd(shape):
        return jax.random.normal(next(keys), shape, jnp.float32) * 0.02

    def rnd_bf16(shape):
        return rnd(shape).astype(jnp.bfloat16)

    smalls = jnp.zeros((N_LAYERS, 6, HIDDEN), jnp.float32)
    smalls = smalls.at[:, _ROW_LN1G, :].set(1.0)               # ln1 gamma
    smalls = smalls.at[:, _ROW_LN2G, :].set(1.0)               # ln2 gamma

    emb_ln = jnp.concatenate([jnp.ones((1, HIDDEN), jnp.float32),
                              jnp.zeros((1, HIDDEN), jnp.float32)], axis=0)  # gamma | beta

    params = {
        "word_emb": rnd((VOCAB, HIDDEN)),
        "pos_emb": rnd((SEQ, HIDDEN)),
        "emb_ln": emb_ln,
        # matmul weights stored bf16 (MXU-native on v6e/v7x, halves weight DMA on v5e);
        # f32 accumulation is requested at every dot inside the kernel.
        # QKV rows (leading dim 3*N_HEADS): [q_h0, q_h1, k_h0, k_h1, v_h0, v_h1]
        "wqkv": rnd_bf16((N_LAYERS, 3 * N_HEADS, HIDDEN, HEAD_DIM)),
        "bqkv": jnp.zeros((N_LAYERS, 3 * N_HEADS, 1, HEAD_DIM), jnp.float32),
        "wo": rnd_bf16((N_LAYERS, N_HEADS, HEAD_DIM, HIDDEN)),
        "w1": rnd_bf16((N_LAYERS, HIDDEN, FFN)),
        "b1": jnp.zeros((N_LAYERS, 1, FFN), jnp.float32),
        "w2": rnd_bf16((N_LAYERS, FFN, HIDDEN)),
        "smalls": smalls,                                      # bo | b2 | ln1g | ln1b | ln2g | ln2b
        # fused classification + sentiment heads
        "head_w": rnd_bf16((HIDDEN, 2 * N_CLASSES)),
        "head_b": jnp.zeros((1, 2 * N_CLASSES), jnp.float32),
    }
    return params


# ---------------- full forward (mirrors MultiTaskSentenceTransformer.forward) ------------------
def multitask_forward(params, input_ids, attention_mask):
    # TODO(synk): token-id embedding gather stays in plain JAX (data-dependent row gather, no
    # clean Pallas win at this scale); everything from emb-LayerNorm onwards is in the kernel.
    x = params["word_emb"][input_ids] + params["pos_emb"][None, :, :]

    # BERT-style extended additive attention mask over keys: (B, 1, S)
    add_mask = ((1.0 - attention_mask.astype(jnp.float32)) * -1e9)[:, None, :]

    return fused_forward(x, add_mask, params)


if __name__ == "__main__":
    key = jax.random.PRNGKey(0)
    pkey, ikey = jax.random.split(key)
    params = init_params(pkey)

    input_ids = jax.random.randint(ikey, (BATCH, SEQ), 0, VOCAB, dtype=jnp.int32)
    attention_mask = jnp.array(
        [[1, 1, 1, 1, 1, 1, 0, 0],
         [1, 1, 1, 1, 1, 1, 1, 1]], dtype=jnp.int32)

    class_logits, sentiment_logits = jax.jit(multitask_forward)(params, input_ids, attention_mask)
    jax.block_until_ready((class_logits, sentiment_logits))

    assert class_logits.shape == (BATCH, N_CLASSES)
    assert sentiment_logits.shape == (BATCH, N_CLASSES)
    assert class_logits.dtype == jnp.float32 and sentiment_logits.dtype == jnp.float32
    assert bool(jnp.all(jnp.isfinite(class_logits))) and bool(jnp.all(jnp.isfinite(sentiment_logits)))
    print("KERNEL_OK")
</pallas_src>

<mosaic_0001>
module attributes {stable_mosaic.version = 11 : i64} {
  func.func @fused_forward_kernel(%arg0: memref<2x8x32xf32, #tpu.memory_space<vmem>>, %arg1: memref<2x1x8xf32, #tpu.memory_space<vmem>>, %arg2: memref<2x32xf32, #tpu.memory_space<vmem>>, %arg3: memref<2x6x32x16xbf16, #tpu.memory_space<vmem>>, %arg4: memref<2x6x1x16xf32, #tpu.memory_space<vmem>>, %arg5: memref<2x2x16x32xbf16, #tpu.memory_space<vmem>>, %arg6: memref<2x32x128xbf16, #tpu.memory_space<vmem>>, %arg7: memref<2x1x128xf32, #tpu.memory_space<vmem>>, %arg8: memref<2x128x32xbf16, #tpu.memory_space<vmem>>, %arg9: memref<2x6x32xf32, #tpu.memory_space<vmem>>, %arg10: memref<32x6xbf16, #tpu.memory_space<vmem>>, %arg11: memref<1x6xf32, #tpu.memory_space<vmem>>, %arg12: memref<2x6xf32, #tpu.memory_space<vmem>>) attributes {dimension_semantics = [], scalar_prefetch = 0 : i64, scratch_operands = 0 : i64, tpu.core_type = #tpu.core_type<tc>} {
    %c0 = arith.constant 0 : index
    %c0_0 = arith.constant 0 : index
    %c0_1 = arith.constant 0 : index
    %0 = vector.load %arg1[%c0, %c0_0, %c0_1] : memref<2x1x8xf32, #tpu.memory_space<vmem>>, vector<2x1x8xf32>
    %1 = vector.shape_cast %0 : vector<2x1x8xf32> to vector<2x1x8xf32>
    %2 = vector.broadcast %1 : vector<2x1x8xf32> to vector<2x8x8xf32>
    %c0_2 = arith.constant 0 : index
    %c0_3 = arith.constant 0 : index
    %c0_4 = arith.constant 0 : index
    %3 = vector.load %arg0[%c0_2, %c0_3, %c0_4] : memref<2x8x32xf32, #tpu.memory_space<vmem>>, vector<2x8x32xf32>
    %4 = vector.shape_cast %3 : vector<2x8x32xf32> to vector<16x32xf32>
    %c0_5 = arith.constant 0 : index
    %c0_6 = arith.constant 0 : index
    %5 = vector.load %arg2[%c0_5, %c0_6] : memref<2x32xf32, #tpu.memory_space<vmem>>, vector<1x32xf32>
    %c1 = arith.constant 1 : index
    %c0_7 = arith.constant 0 : index
    %6 = vector.load %arg2[%c1, %c0_7] : memref<2x32xf32, #tpu.memory_space<vmem>>, vector<1x32xf32>
    %cst = arith.constant dense<0.000000e+00> : vector<16xf32>
    %7 = vector.multi_reduction <add>, %4, %cst [1] : vector<16x32xf32> to vector<16xf32>
    %8 = vector.shape_cast %7 : vector<16xf32> to vector<16x1xf32>
    %cst_8 = arith.constant 3.200000e+01 : f32
    %9 = vector.broadcast %cst_8 : f32 to vector<16x1xf32>
    %10 = arith.divf %8, %9 : vector<16x1xf32>
    %11 = vector.broadcast %10 : vector<16x1xf32> to vector<16x32xf32>
    %12 = arith.subf %4, %11 : vector<16x32xf32>
    %13 = arith.mulf %12, %12 : vector<16x32xf32>
    %cst_9 = arith.constant dense<0.000000e+00> : vector<16xf32>
    %14 = vector.multi_reduction <add>, %13, %cst_9 [1] : vector<16x32xf32> to vector<16xf32>
    %15 = vector.shape_cast %14 : vector<16xf32> to vector<16x1xf32>
    %cst_10 = arith.constant 3.200000e+01 : f32
    %16 = vector.broadcast %cst_10 : f32 to vector<16x1xf32>
    %17 = arith.divf %15, %16 : vector<16x1xf32>
    %18 = vector.broadcast %10 : vector<16x1xf32> to vector<16x32xf32>
    %19 = arith.subf %4, %18 : vector<16x32xf32>
    %cst_11 = arith.constant 9.99999996E-13 : f32
    %20 = vector.broadcast %cst_11 : f32 to vector<16x1xf32>
    %21 = arith.addf %17, %20 : vector<16x1xf32>
    %22 = math.rsqrt %21 : vector<16x1xf32>
    %23 = vector.broadcast %22 : vector<16x1xf32> to vector<16x32xf32>
    %24 = arith.mulf %19, %23 : vector<16x32xf32>
    %25 = vector.broadcast %5 : vector<1x32xf32> to vector<16x32xf32>
    %26 = arith.mulf %24, %25 : vector<16x32xf32>
    %27 = vector.broadcast %6 : vector<1x32xf32> to vector<16x32xf32>
    %28 = arith.addf %26, %27 : vector<16x32xf32>
    %c0_12 = arith.constant 0 : index
    %c0_13 = arith.constant 0 : index
    %c0_14 = arith.constant 0 : index
    %29 = vector.load %arg9[%c0_12, %c0_13, %c0_14] : memref<2x6x32xf32, #tpu.memory_space<vmem>>, vector<1x6x32xf32>
    %30 = vector.shape_cast %29 : vector<1x6x32xf32> to vector<6x32xf32>
    %31 = vector.extract_strided_slice %30 {offsets = [0, 0], sizes = [1, 32], strides = [1, 1]} : vector<6x32xf32> to vector<1x32xf32>
    %32 = vector.extract_strided_slice %30 {offsets = [1, 0], sizes = [1, 32], strides = [1, 1]} : vector<6x32xf32> to vector<1x32xf32>
    %33 = vector.extract_strided_slice %30 {offsets = [2, 0], sizes = [1, 32], strides = [1, 1]} : vector<6x32xf32> to vector<1x32xf32>
    %34 = vector.extract_strided_slice %30 {offsets = [3, 0], sizes = [1, 32], strides = [1, 1]} : vector<6x32xf32> to vector<1x32xf32>
    %35 = vector.extract_strided_slice %30 {offsets = [4, 0], sizes = [1, 32], strides = [1, 1]} : vector<6x32xf32> to vector<1x32xf32>
    %36 = vector.extract_strided_slice %30 {offsets = [5, 0], sizes = [1, 32], strides = [1, 1]} : vector<6x32xf32> to vector<1x32xf32>
    %37 = arith.truncf %28 : vector<16x32xf32> to vector<16x32xbf16>
    %cst_15 = arith.constant 0.000000e+00 : f32
    %38 = vector.broadcast %cst_15 : f32 to vector<16x32xf32>
    %c0_16 = arith.constant 0 : index
    %c0_17 = arith.constant 0 : index
    %c0_18 = arith.constant 0 : index
    %c0_19 = arith.constant 0 : index
    %39 = vector.load %arg3[%c0_16, %c0_17, %c0_18, %c0_19] : memref<2x6x32x16xbf16, #tpu.memory_space<vmem>>, vector<1x1x32x16xbf16>
    %40 = vector.shape_cast %39 : vector<1x1x32x16xbf16> to vector<32x16xbf16>
    %cst_20 = arith.constant dense<0.000000e+00> : vector<16x16xf32>
    %41 = tpu.matmul %37, %40, %cst_20 {dimension_numbers = #tpu.dot_dimension_numbers<[1], [0], [0], [1], [0, 0, 1, 1], [], []>} : vector<16x32xbf16>, vector<32x16xbf16>, vector<16x16xf32> -> vector<16x16xf32>
    %c0_21 = arith.constant 0 : index
    %c0_22 = arith.constant 0 : index
    %c0_23 = arith.constant 0 : index
    %c0_24 = arith.constant 0 : index
    %42 = vector.load %arg4[%c0_21, %c0_22, %c0_23, %c0_24] : memref<2x6x1x16xf32, #tpu.memory_space<vmem>>, vector<1x1x1x16xf32>
    %43 = vector.shape_cast %42 : vector<1x1x1x16xf32> to vector<1x16xf32>
    %44 = vector.broadcast %43 : vector<1x16xf32> to vector<16x16xf32>
    %45 = arith.addf %41, %44 : vector<16x16xf32>
    %46 = vector.shape_cast %45 : vector<16x16xf32> to vector<2x8x16xf32>
    %c0_25 = arith.constant 0 : index
    %c2 = arith.constant 2 : index
    %c0_26 = arith.constant 0 : index
    %c0_27 = arith.constant 0 : index
    %47 = vector.load %arg3[%c0_25, %c2, %c0_26, %c0_27] : memref<2x6x32x16xbf16, #tpu.memory_space<vmem>>, vector<1x1x32x16xbf16>
    %48 = vector.shape_cast %47 : vector<1x1x32x16xbf16> to vector<32x16xbf16>
    %cst_28 = arith.constant dense<0.000000e+00> : vector<16x16xf32>
    %49 = tpu.matmul %37, %48, %cst_28 {dimension_numbers = #tpu.dot_dimension_numbers<[1], [0], [0], [1], [0, 0, 1, 1], [], []>} : vector<16x32xbf16>, vector<32x16xbf16>, vector<16x16xf32> -> vector<16x16xf32>
    %c0_29 = arith.constant 0 : index
    %c2_30 = arith.constant 2 : index
    %c0_31 = arith.constant 0 : index
    %c0_32 = arith.constant 0 : index
    %50 = vector.load %arg4[%c0_29, %c2_30, %c0_31, %c0_32] : memref<2x6x1x16xf32, #tpu.memory_space<vmem>>, vector<1x1x1x16xf32>
    %51 = vector.shape_cast %50 : vector<1x1x1x16xf32> to vector<1x16xf32>
    %52 = vector.broadcast %51 : vector<1x16xf32> to vector<16x16xf32>
    %53 = arith.addf %49, %52 : vector<16x16xf32>
    %54 = vector.shape_cast %53 : vector<16x16xf32> to vector<2x8x16xf32>
    %c0_33 = arith.constant 0 : index
    %c4 = arith.constant 4 : index
    %c0_34 = arith.constant 0 : index
    %c0_35 = arith.constant 0 : index
    %55 = vector.load %arg3[%c0_33, %c4, %c0_34, %c0_35] : memref<2x6x32x16xbf16, #tpu.memory_space<vmem>>, vector<1x1x32x16xbf16>
    %56 = vector.shape_cast %55 : vector<1x1x32x16xbf16> to vector<32x16xbf16>
    %cst_36 = arith.constant dense<0.000000e+00> : vector<16x16xf32>
    %57 = tpu.matmul %37, %56, %cst_36 {dimension_numbers = #tpu.dot_dimension_numbers<[1], [0], [0], [1], [0, 0, 1, 1], [], []>} : vector<16x32xbf16>, vector<32x16xbf16>, vector<16x16xf32> -> vector<16x16xf32>
    %c0_37 = arith.constant 0 : index
    %c4_38 = arith.constant 4 : index
    %c0_39 = arith.constant 0 : index
    %c0_40 = arith.constant 0 : index
    %58 = vector.load %arg4[%c0_37, %c4_38, %c0_39, %c0_40] : memref<2x6x1x16xf32, #tpu.memory_space<vmem>>, vector<1x1x1x16xf32>
    %59 = vector.shape_cast %58 : vector<1x1x1x16xf32> to vector<1x16xf32>
    %60 = vector.broadcast %59 : vector<1x16xf32> to vector<16x16xf32>
    %61 = arith.addf %57, %60 : vector<16x16xf32>
    %62 = vector.shape_cast %61 : vector<16x16xf32> to vector<2x8x16xf32>
    %63 = arith.truncf %46 : vector<2x8x16xf32> to vector<2x8x16xbf16>
    %64 = arith.truncf %54 : vector<2x8x16xf32> to vector<2x8x16xbf16>
    "tpu.trace_start"() <{level = 10 : i32, message = "bqd,bkd->bqk"}> : () -> ()
    %cst_41 = arith.constant dense<0.000000e+00> : vector<2x8x8xf32>
    %65 = tpu.matmul %63, %64, %cst_41 {dimension_numbers = #tpu.dot_dimension_numbers<[2], [2], [1], [1], [0, 0, 0, 1, 1, 1], [0], [0]>} : vector<2x8x16xbf16>, vector<2x8x16xbf16>, vector<2x8x8xf32> -> vector<2x8x8xf32>
    "tpu.trace_stop"() : () -> ()
    %cst_42 = arith.constant 2.500000e-01 : f32
    %66 = vector.broadcast %cst_42 : f32 to vector<2x8x8xf32>
    %67 = arith.mulf %65, %66 : vector<2x8x8xf32>
    %68 = arith.addf %67, %2 : vector<2x8x8xf32>
    %cst_43 = arith.constant dense<0xFF800000> : vector<2x8xf32>
    %69 = vector.multi_reduction <maximumf>, %68, %cst_43 [2] : vector<2x8x8xf32> to vector<2x8xf32>
    %70 = vector.shape_cast %69 : vector<2x8xf32> to vector<2x8x1xf32>
    %71 = vector.broadcast %70 : vector<2x8x1xf32> to vector<2x8x8xf32>
    %72 = arith.subf %68, %71 : vector<2x8x8xf32>
    %73 = math.exp %72 : vector<2x8x8xf32>
    %cst_44 = arith.constant dense<0.000000e+00> : vector<2x8xf32>
    %74 = vector.multi_reduction <add>, %73, %cst_44 [2] : vector<2x8x8xf32> to vector<2x8xf32>
    %75 = vector.shape_cast %74 : vector<2x8xf32> to vector<2x8x1xf32>
    %76 = tpu.reciprocal %75 {approx = true} : vector<2x8x1xf32> -> vector<2x8x1xf32>
    %77 = vector.broadcast %76 : vector<2x8x1xf32> to vector<2x8x8xf32>
    %78 = arith.mulf %73, %77 : vector<2x8x8xf32>
    %79 = arith.truncf %78 : vector<2x8x8xf32> to vector<2x8x8xbf16>
    %80 = arith.truncf %62 : vector<2x8x16xf32> to vector<2x8x16xbf16>
    "tpu.trace_start"() <{level = 10 : i32, message = "bqk,bkd->bqd"}> : () -> ()
    %cst_45 = arith.constant dense<0.000000e+00> : vector<2x8x16xf32>
    %81 = tpu.matmul %79, %80, %cst_45 {dimension_numbers = #tpu.dot_dimension_numbers<[2], [1], [1], [2], [0, 0, 0, 1, 1, 2], [0], [0]>} : vector<2x8x8xbf16>, vector<2x8x16xbf16>, vector<2x8x16xf32> -> vector<2x8x16xf32>
    "tpu.trace_stop"() : () -> ()
    %82 = vector.shape_cast %81 : vector<2x8x16xf32> to vector<16x16xf32>
    %83 = arith.truncf %82 : vector<16x16xf32> to vector<16x16xbf16>
    %c0_46 = arith.constant 0 : index
    %c0_47 = arith.constant 0 : index
    %c0_48 = arith.constant 0 : index
    %c0_49 = arith.constant 0 : index
    %84 = vector.load %arg5[%c0_46, %c0_47, %c0_48, %c0_49] : memref<2x2x16x32xbf16, #tpu.memory_space<vmem>>, vector<1x1x16x32xbf16>
    %85 = vector.shape_cast %84 : vector<1x1x16x32xbf16> to vector<16x32xbf16>
    %cst_50 = arith.constant dense<0.000000e+00> : vector<16x32xf32>
    %86 = tpu.matmul %83, %85, %cst_50 {dimension_numbers = #tpu.dot_dimension_numbers<[1], [0], [0], [1], [0, 0, 1, 1], [], []>} : vector<16x16xbf16>, vector<16x32xbf16>, vector<16x32xf32> -> vector<16x32xf32>
    %87 = arith.addf %38, %86 : vector<16x32xf32>
    %c0_51 = arith.constant 0 : index
    %c1_52 = arith.constant 1 : index
    %c0_53 = arith.constant 0 : index
    %c0_54 = arith.constant 0 : index
    %88 = vector.load %arg3[%c0_51, %c1_52, %c0_53, %c0_54] : memref<2x6x32x16xbf16, #tpu.memory_space<vmem>>, vector<1x1x32x16xbf16>
    %89 = vector.shape_cast %88 : vector<1x1x32x16xbf16> to vector<32x16xbf16>
    %cst_55 = arith.constant dense<0.000000e+00> : vector<16x16xf32>
    %90 = tpu.matmul %37, %89, %cst_55 {dimension_numbers = #tpu.dot_dimension_numbers<[1], [0], [0], [1], [0, 0, 1, 1], [], []>} : vector<16x32xbf16>, vector<32x16xbf16>, vector<16x16xf32> -> vector<16x16xf32>
    %c0_56 = arith.constant 0 : index
    %c1_57 = arith.constant 1 : index
    %c0_58 = arith.constant 0 : index
    %c0_59 = arith.constant 0 : index
    %91 = vector.load %arg4[%c0_56, %c1_57, %c0_58, %c0_59] : memref<2x6x1x16xf32, #tpu.memory_space<vmem>>, vector<1x1x1x16xf32>
    %92 = vector.shape_cast %91 : vector<1x1x1x16xf32> to vector<1x16xf32>
    %93 = vector.broadcast %92 : vector<1x16xf32> to vector<16x16xf32>
    %94 = arith.addf %90, %93 : vector<16x16xf32>
    %95 = vector.shape_cast %94 : vector<16x16xf32> to vector<2x8x16xf32>
    %c0_60 = arith.constant 0 : index
    %c3 = arith.constant 3 : index
    %c0_61 = arith.constant 0 : index
    %c0_62 = arith.constant 0 : index
    %96 = vector.load %arg3[%c0_60, %c3, %c0_61, %c0_62] : memref<2x6x32x16xbf16, #tpu.memory_space<vmem>>, vector<1x1x32x16xbf16>
    %97 = vector.shape_cast %96 : vector<1x1x32x16xbf16> to vector<32x16xbf16>
    %cst_63 = arith.constant dense<0.000000e+00> : vector<16x16xf32>
    %98 = tpu.matmul %37, %97, %cst_63 {dimension_numbers = #tpu.dot_dimension_numbers<[1], [0], [0], [1], [0, 0, 1, 1], [], []>} : vector<16x32xbf16>, vector<32x16xbf16>, vector<16x16xf32> -> vector<16x16xf32>
    %c0_64 = arith.constant 0 : index
    %c3_65 = arith.constant 3 : index
    %c0_66 = arith.constant 0 : index
    %c0_67 = arith.constant 0 : index
    %99 = vector.load %arg4[%c0_64, %c3_65, %c0_66, %c0_67] : memref<2x6x1x16xf32, #tpu.memory_space<vmem>>, vector<1x1x1x16xf32>
    %100 = vector.shape_cast %99 : vector<1x1x1x16xf32> to vector<1x16xf32>
    %101 = vector.broadcast %100 : vector<1x16xf32> to vector<16x16xf32>
    %102 = arith.addf %98, %101 : vector<16x16xf32>
    %103 = vector.shape_cast %102 : vector<16x16xf32> to vector<2x8x16xf32>
    %c0_68 = arith.constant 0 : index
    %c5 = arith.constant 5 : index
    %c0_69 = arith.constant 0 : index
    %c0_70 = arith.constant 0 : index
    %104 = vector.load %arg3[%c0_68, %c5, %c0_69, %c0_70] : memref<2x6x32x16xbf16, #tpu.memory_space<vmem>>, vector<1x1x32x16xbf16>
    %105 = vector.shape_cast %104 : vector<1x1x32x16xbf16> to vector<32x16xbf16>
    %cst_71 = arith.constant dense<0.000000e+00> : vector<16x16xf32>
    %106 = tpu.matmul %37, %105, %cst_71 {dimension_numbers = #tpu.dot_dimension_numbers<[1], [0], [0], [1], [0, 0, 1, 1], [], []>} : vector<16x32xbf16>, vector<32x16xbf16>, vector<16x16xf32> -> vector<16x16xf32>
    %c0_72 = arith.constant 0 : index
    %c5_73 = arith.constant 5 : index
    %c0_74 = arith.constant 0 : index
    %c0_75 = arith.constant 0 : index
    %107 = vector.load %arg4[%c0_72, %c5_73, %c0_74, %c0_75] : memref<2x6x1x16xf32, #tpu.memory_space<vmem>>, vector<1x1x1x16xf32>
    %108 = vector.shape_cast %107 : vector<1x1x1x16xf32> to vector<1x16xf32>
    %109 = vector.broadcast %108 : vector<1x16xf32> to vector<16x16xf32>
    %110 = arith.addf %106, %109 : vector<16x16xf32>
    %111 = vector.shape_cast %110 : vector<16x16xf32> to vector<2x8x16xf32>
    %112 = arith.truncf %95 : vector<2x8x16xf32> to vector<2x8x16xbf16>
    %113 = arith.truncf %103 : vector<2x8x16xf32> to vector<2x8x16xbf16>
    "tpu.trace_start"() <{level = 10 : i32, message = "bqd,bkd->bqk"}> : () -> ()
    %cst_76 = arith.constant dense<0.000000e+00> : vector<2x8x8xf32>
    %114 = tpu.matmul %112, %113, %cst_76 {dimension_numbers = #tpu.dot_dimension_numbers<[2], [2], [1], [1], [0, 0, 0, 1, 1, 1], [0], [0]>} : vector<2x8x16xbf16>, vector<2x8x16xbf16>, vector<2x8x8xf32> -> vector<2x8x8xf32>
    "tpu.trace_stop"() : () -> ()
    %cst_77 = arith.constant 2.500000e-01 : f32
    %115 = vector.broadcast %cst_77 : f32 to vector<2x8x8xf32>
    %116 = arith.mulf %114, %115 : vector<2x8x8xf32>
    %117 = arith.addf %116, %2 : vector<2x8x8xf32>
    %cst_78 = arith.constant dense<0xFF800000> : vector<2x8xf32>
    %118 = vector.multi_reduction <maximumf>, %117, %cst_78 [2] : vector<2x8x8xf32> to vector<2x8xf32>
    %119 = vector.shape_cast %118 : vector<2x8xf32> to vector<2x8x1xf32>
    %120 = vector.broadcast %119 : vector<2x8x1xf32> to vector<2x8x8xf32>
    %121 = arith.subf %117, %120 : vector<2x8x8xf32>
    %122 = math.exp %121 : vector<2x8x8xf32>
    %cst_79 = arith.constant dense<0.000000e+00> : vector<2x8xf32>
    %123 = vector.multi_reduction <add>, %122, %cst_79 [2] : vector<2x8x8xf32> to vector<2x8xf32>
    %124 = vector.shape_cast %123 : vector<2x8xf32> to vector<2x8x1xf32>
    %125 = tpu.reciprocal %124 {approx = true} : vector<2x8x1xf32> -> vector<2x8x1xf32>
    %126 = vector.broadcast %125 : vector<2x8x1xf32> to vector<2x8x8xf32>
    %127 = arith.mulf %122, %126 : vector<2x8x8xf32>
    %128 = arith.truncf %127 : vector<2x8x8xf32> to vector<2x8x8xbf16>
    %129 = arith.truncf %111 : vector<2x8x16xf32> to vector<2x8x16xbf16>
    "tpu.trace_start"() <{level = 10 : i32, message = "bqk,bkd->bqd"}> : () -> ()
    %cst_80 = arith.constant dense<0.000000e+00> : vector<2x8x16xf32>
    %130 = tpu.matmul %128, %129, %cst_80 {dimension_numbers = #tpu.dot_dimension_numbers<[2], [1], [1], [2], [0, 0, 0, 1, 1, 2], [0], [0]>} : vector<2x8x8xbf16>, vector<2x8x16xbf16>, vector<2x8x16xf32> -> vector<2x8x16xf32>
    "tpu.trace_stop"() : () -> ()
    %131 = vector.shape_cast %130 : vector<2x8x16xf32> to vector<16x16xf32>
    %132 = arith.truncf %131 : vector<16x16xf32> to vector<16x16xbf16>
    %c0_81 = arith.constant 0 : index
    %c1_82 = arith.constant 1 : index
    %c0_83 = arith.constant 0 : index
    %c0_84 = arith.constant 0 : index
    %133 = vector.load %arg5[%c0_81, %c1_82, %c0_83, %c0_84] : memref<2x2x16x32xbf16, #tpu.memory_space<vmem>>, vector<1x1x16x32xbf16>
    %134 = vector.shape_cast %133 : vector<1x1x16x32xbf16> to vector<16x32xbf16>
    %cst_85 = arith.constant dense<0.000000e+00> : vector<16x32xf32>
    %135 = tpu.matmul %132, %134, %cst_85 {dimension_numbers = #tpu.dot_dimension_numbers<[1], [0], [0], [1], [0, 0, 1, 1], [], []>} : vector<16x16xbf16>, vector<16x32xbf16>, vector<16x32xf32> -> vector<16x32xf32>
    %136 = arith.addf %87, %135 : vector<16x32xf32>
    %137 = arith.addf %28, %136 : vector<16x32xf32>
    %138 = vector.broadcast %31 : vector<1x32xf32> to vector<16x32xf32>
    %139 = arith.addf %137, %138 : vector<16x32xf32>
    %cst_86 = arith.constant dense<0.000000e+00> : vector<16xf32>
    %140 = vector.multi_reduction <add>, %139, %cst_86 [1] : vector<16x32xf32> to vector<16xf32>
    %141 = vector.shape_cast %140 : vector<16xf32> to vector<16x1xf32>
    %cst_87 = arith.constant 3.200000e+01 : f32
    %142 = vector.broadcast %cst_87 : f32 to vector<16x1xf32>
    %143 = arith.divf %141, %142 : vector<16x1xf32>
    %144 = vector.broadcast %143 : vector<16x1xf32> to vector<16x32xf32>
    %145 = arith.subf %139, %144 : vector<16x32xf32>
    %146 = arith.mulf %145, %145 : vector<16x32xf32>
    %cst_88 = arith.constant dense<0.000000e+00> : vector<16xf32>
    %147 = vector.multi_reduction <add>, %146, %cst_88 [1] : vector<16x32xf32> to vector<16xf32>
    %148 = vector.shape_cast %147 : vector<16xf32> to vector<16x1xf32>
    %cst_89 = arith.constant 3.200000e+01 : f32
    %149 = vector.broadcast %cst_89 : f32 to vector<16x1xf32>
    %150 = arith.divf %148, %149 : vector<16x1xf32>
    %151 = vector.broadcast %143 : vector<16x1xf32> to vector<16x32xf32>
    %152 = arith.subf %139, %151 : vector<16x32xf32>
    %cst_90 = arith.constant 9.99999996E-13 : f32
    %153 = vector.broadcast %cst_90 : f32 to vector<16x1xf32>
    %154 = arith.addf %150, %153 : vector<16x1xf32>
    %155 = math.rsqrt %154 : vector<16x1xf32>
    %156 = vector.broadcast %155 : vector<16x1xf32> to vector<16x32xf32>
    %157 = arith.mulf %152, %156 : vector<16x32xf32>
    %158 = vector.broadcast %33 : vector<1x32xf32> to vector<16x32xf32>
    %159 = arith.mulf %157, %158 : vector<16x32xf32>
    %160 = vector.broadcast %34 : vector<1x32xf32> to vector<16x32xf32>
    %161 = arith.addf %159, %160 : vector<16x32xf32>
    %162 = arith.truncf %161 : vector<16x32xf32> to vector<16x32xbf16>
    %c0_91 = arith.constant 0 : index
    %c0_92 = arith.constant 0 : index
    %c0_93 = arith.constant 0 : index
    %163 = vector.load %arg6[%c0_91, %c0_92, %c0_93] : memref<2x32x128xbf16, #tpu.memory_space<vmem>>, vector<1x32x128xbf16>
    %164 = vector.shape_cast %163 : vector<1x32x128xbf16> to vector<32x128xbf16>
    %cst_94 = arith.constant dense<0.000000e+00> : vector<16x128xf32>
    %165 = tpu.matmul %162, %164, %cst_94 {dimension_numbers = #tpu.dot_dimension_numbers<[1], [0], [0], [1], [0, 0, 1, 1], [], []>} : vector<16x32xbf16>, vector<32x128xbf16>, vector<16x128xf32> -> vector<16x128xf32>
    %c0_95 = arith.constant 0 : index
    %c0_96 = arith.constant 0 : index
    %c0_97 = arith.constant 0 : index
    %166 = vector.load %arg7[%c0_95, %c0_96, %c0_97] : memref<2x1x128xf32, #tpu.memory_space<vmem>>, vector<1x1x128xf32>
    %167 = vector.shape_cast %166 : vector<1x1x128xf32> to vector<1x128xf32>
    %168 = vector.broadcast %167 : vector<1x128xf32> to vector<16x128xf32>
    %169 = arith.addf %165, %168 : vector<16x128xf32>
    %cst_98 = arith.constant 5.000000e-01 : f32
    %170 = vector.broadcast %cst_98 : f32 to vector<16x128xf32>
    %171 = arith.mulf %170, %169 : vector<16x128xf32>
    %cst_99 = arith.constant 4.471500e-02 : f32
    %172 = vector.broadcast %cst_99 : f32 to vector<16x128xf32>
    %173 = arith.mulf %172, %169 : vector<16x128xf32>
    %174 = arith.mulf %173, %169 : vector<16x128xf32>
    %175 = arith.mulf %174, %169 : vector<16x128xf32>
    %176 = arith.addf %169, %175 : vector<16x128xf32>
    %cst_100 = arith.constant 0.797884583 : f32
    %177 = vector.broadcast %cst_100 : f32 to vector<16x128xf32>
    %178 = arith.mulf %177, %176 : vector<16x128xf32>
    %179 = math.tanh %178 : vector<16x128xf32>
    %cst_101 = arith.constant 1.000000e+00 : f32
    %180 = vector.broadcast %cst_101 : f32 to vector<16x128xf32>
    %181 = arith.addf %180, %179 : vector<16x128xf32>
    %182 = arith.mulf %171, %181 : vector<16x128xf32>
    %183 = arith.truncf %182 : vector<16x128xf32> to vector<16x128xbf16>
    %c0_102 = arith.constant 0 : index
    %c0_103 = arith.constant 0 : index
    %c0_104 = arith.constant 0 : index
    %184 = vector.load %arg8[%c0_102, %c0_103, %c0_104] : memref<2x128x32xbf16, #tpu.memory_space<vmem>>, vector<1x128x32xbf16>
    %185 = vector.shape_cast %184 : vector<1x128x32xbf16> to vector<128x32xbf16>
    %cst_105 = arith.constant dense<0.000000e+00> : vector<16x32xf32>
    %186 = tpu.matmul %183, %185, %cst_105 {dimension_numbers = #tpu.dot_dimension_numbers<[1], [0], [0], [1], [0, 0, 1, 1], [], []>} : vector<16x128xbf16>, vector<128x32xbf16>, vector<16x32xf32> -> vector<16x32xf32>
    %187 = vector.broadcast %32 : vector<1x32xf32> to vector<16x32xf32>
    %188 = arith.addf %186, %187 : vector<16x32xf32>
    %189 = arith.addf %161, %188 : vector<16x32xf32>
    %cst_106 = arith.constant dense<0.000000e+00> : vector<16xf32>
    %190 = vector.multi_reduction <add>, %189, %cst_106 [1] : vector<16x32xf32> to vector<16xf32>
    %191 = vector.shape_cast %190 : vector<16xf32> to vector<16x1xf32>
    %cst_107 = arith.constant 3.200000e+01 : f32
    %192 = vector.broadcast %cst_107 : f32 to vector<16x1xf32>
    %193 = arith.divf %191, %192 : vector<16x1xf32>
    %194 = vector.broadcast %193 : vector<16x1xf32> to vector<16x32xf32>
    %195 = arith.subf %189, %194 : vector<16x32xf32>
    %196 = arith.mulf %195, %195 : vector<16x32xf32>
    %cst_108 = arith.constant dense<0.000000e+00> : vector<16xf32>
    %197 = vector.multi_reduction <add>, %196, %cst_108 [1] : vector<16x32xf32> to vector<16xf32>
    %198 = vector.shape_cast %197 : vector<16xf32> to vector<16x1xf32>
    %cst_109 = arith.constant 3.200000e+01 : f32
    %199 = vector.broadcast %cst_109 : f32 to vector<16x1xf32>
    %200 = arith.divf %198, %199 : vector<16x1xf32>
    %201 = vector.broadcast %193 : vector<16x1xf32> to vector<16x32xf32>
    %202 = arith.subf %189, %201 : vector<16x32xf32>
    %cst_110 = arith.constant 9.99999996E-13 : f32
    %203 = vector.broadcast %cst_110 : f32 to vector<16x1xf32>
    %204 = arith.addf %200, %203 : vector<16x1xf32>
    %205 = math.rsqrt %204 : vector<16x1xf32>
    %206 = vector.broadcast %205 : vector<16x1xf32> to vector<16x32xf32>
    %207 = arith.mulf %202, %206 : vector<16x32xf32>
    %208 = vector.broadcast %35 : vector<1x32xf32> to vector<16x32xf32>
    %209 = arith.mulf %207, %208 : vector<16x32xf32>
    %210 = vector.broadcast %36 : vector<1x32xf32> to vector<16x32xf32>
    %211 = arith.addf %209, %210 : vector<16x32xf32>
    %c1_111 = arith.constant 1 : index
    %c0_112 = arith.constant 0 : index
    %c0_113 = arith.constant 0 : index
    %212 = vector.load %arg9[%c1_111, %c0_112, %c0_113] : memref<2x6x32xf32, #tpu.memory_space<vmem>>, vector<1x6x32xf32>
    %213 = vector.shape_cast %212 : vector<1x6x32xf32> to vector<6x32xf32>
    %214 = vector.extract_strided_slice %213 {offsets = [0, 0], sizes = [1, 32], strides = [1, 1]} : vector<6x32xf32> to vector<1x32xf32>
    %215 = vector.extract_strided_slice %213 {offsets = [1, 0], sizes = [1, 32], strides = [1, 1]} : vector<6x32xf32> to vector<1x32xf32>
    %216 = vector.extract_strided_slice %213 {offsets = [2, 0], sizes = [1, 32], strides = [1, 1]} : vector<6x32xf32> to vector<1x32xf32>
    %217 = vector.extract_strided_slice %213 {offsets = [3, 0], sizes = [1, 32], strides = [1, 1]} : vector<6x32xf32> to vector<1x32xf32>
    %218 = vector.extract_strided_slice %213 {offsets = [4, 0], sizes = [1, 32], strides = [1, 1]} : vector<6x32xf32> to vector<1x32xf32>
    %219 = vector.extract_strided_slice %213 {offsets = [5, 0], sizes = [1, 32], strides = [1, 1]} : vector<6x32xf32> to vector<1x32xf32>
    %220 = arith.truncf %211 : vector<16x32xf32> to vector<16x32xbf16>
    %cst_114 = arith.constant 0.000000e+00 : f32
    %221 = vector.broadcast %cst_114 : f32 to vector<16x32xf32>
    %c1_115 = arith.constant 1 : index
    %c0_116 = arith.constant 0 : index
    %c0_117 = arith.constant 0 : index
    %c0_118 = arith.constant 0 : index
    %222 = vector.load %arg3[%c1_115, %c0_116, %c0_117, %c0_118] : memref<2x6x32x16xbf16, #tpu.memory_space<vmem>>, vector<1x1x32x16xbf16>
    %223 = vector.shape_cast %222 : vector<1x1x32x16xbf16> to vector<32x16xbf16>
    %cst_119 = arith.constant dense<0.000000e+00> : vector<16x16xf32>
    %224 = tpu.matmul %220, %223, %cst_119 {dimension_numbers = #tpu.dot_dimension_numbers<[1], [0], [0], [1], [0, 0, 1, 1], [], []>} : vector<16x32xbf16>, vector<32x16xbf16>, vector<16x16xf32> -> vector<16x16xf32>
    %c1_120 = arith.constant 1 : index
    %c0_121 = arith.constant 0 : index
    %c0_122 = arith.constant 0 : index
    %c0_123 = arith.constant 0 : index
    %225 = vector.load %arg4[%c1_120, %c0_121, %c0_122, %c0_123] : memref<2x6x1x16xf32, #tpu.memory_space<vmem>>, vector<1x1x1x16xf32>
    %226 = vector.shape_cast %225 : vector<1x1x1x16xf32> to vector<1x16xf32>
    %227 = vector.broadcast %226 : vector<1x16xf32> to vector<16x16xf32>
    %228 = arith.addf %224, %227 : vector<16x16xf32>
    %229 = vector.shape_cast %228 : vector<16x16xf32> to vector<2x8x16xf32>
    %c1_124 = arith.constant 1 : index
    %c2_125 = arith.constant 2 : index
    %c0_126 = arith.constant 0 : index
    %c0_127 = arith.constant 0 : index
    %230 = vector.load %arg3[%c1_124, %c2_125, %c0_126, %c0_127] : memref<2x6x32x16xbf16, #tpu.memory_space<vmem>>, vector<1x1x32x16xbf16>
    %231 = vector.shape_cast %230 : vector<1x1x32x16xbf16> to vector<32x16xbf16>
    %cst_128 = arith.constant dense<0.000000e+00> : vector<16x16xf32>
    %232 = tpu.matmul %220, %231, %cst_128 {dimension_numbers = #tpu.dot_dimension_numbers<[1], [0], [0], [1], [0, 0, 1, 1], [], []>} : vector<16x32xbf16>, vector<32x16xbf16>, vector<16x16xf32> -> vector<16x16xf32>
    %c1_129 = arith.constant 1 : index
    %c2_130 = arith.constant 2 : index
    %c0_131 = arith.constant 0 : index
    %c0_132 = arith.constant 0 : index
    %233 = vector.load %arg4[%c1_129, %c2_130, %c0_131, %c0_132] : memref<2x6x1x16xf32, #tpu.memory_space<vmem>>, vector<1x1x1x16xf32>
    %234 = vector.shape_cast %233 : vector<1x1x1x16xf32> to vector<1x16xf32>
    %235 = vector.broadcast %234 : vector<1x16xf32> to vector<16x16xf32>
    %236 = arith.addf %232, %235 : vector<16x16xf32>
    %237 = vector.shape_cast %236 : vector<16x16xf32> to vector<2x8x16xf32>
    %c1_133 = arith.constant 1 : index
    %c4_134 = arith.constant 4 : index
    %c0_135 = arith.constant 0 : index
    %c0_136 = arith.constant 0 : index
    %238 = vector.load %arg3[%c1_133, %c4_134, %c0_135, %c0_136] : memref<2x6x32x16xbf16, #tpu.memory_space<vmem>>, vector<1x1x32x16xbf16>
    %239 = vector.shape_cast %238 : vector<1x1x32x16xbf16> to vector<32x16xbf16>
    %cst_137 = arith.constant dense<0.000000e+00> : vector<16x16xf32>
    %240 = tpu.matmul %220, %239, %cst_137 {dimension_numbers = #tpu.dot_dimension_numbers<[1], [0], [0], [1], [0, 0, 1, 1], [], []>} : vector<16x32xbf16>, vector<32x16xbf16>, vector<16x16xf32> -> vector<16x16xf32>
    %c1_138 = arith.constant 1 : index
    %c4_139 = arith.constant 4 : index
    %c0_140 = arith.constant 0 : index
    %c0_141 = arith.constant 0 : index
    %241 = vector.load %arg4[%c1_138, %c4_139, %c0_140, %c0_141] : memref<2x6x1x16xf32, #tpu.memory_space<vmem>>, vector<1x1x1x16xf32>
    %242 = vector.shape_cast %241 : vector<1x1x1x16xf32> to vector<1x16xf32>
    %243 = vector.broadcast %242 : vector<1x16xf32> to vector<16x16xf32>
    %244 = arith.addf %240, %243 : vector<16x16xf32>
    %245 = vector.shape_cast %244 : vector<16x16xf32> to vector<2x8x16xf32>
    %246 = arith.truncf %229 : vector<2x8x16xf32> to vector<2x8x16xbf16>
    %247 = arith.truncf %237 : vector<2x8x16xf32> to vector<2x8x16xbf16>
    "tpu.trace_start"() <{level = 10 : i32, message = "bqd,bkd->bqk"}> : () -> ()
    %cst_142 = arith.constant dense<0.000000e+00> : vector<2x8x8xf32>
    %248 = tpu.matmul %246, %247, %cst_142 {dimension_numbers = #tpu.dot_dimension_numbers<[2], [2], [1], [1], [0, 0, 0, 1, 1, 1], [0], [0]>} : vector<2x8x16xbf16>, vector<2x8x16xbf16>, vector<2x8x8xf32> -> vector<2x8x8xf32>
    "tpu.trace_stop"() : () -> ()
    %cst_143 = arith.constant 2.500000e-01 : f32
    %249 = vector.broadcast %cst_143 : f32 to vector<2x8x8xf32>
    %250 = arith.mulf %248, %249 : vector<2x8x8xf32>
    %251 = arith.addf %250, %2 : vector<2x8x8xf32>
    %cst_144 = arith.constant dense<0xFF800000> : vector<2x8xf32>
    %252 = vector.multi_reduction <maximumf>, %251, %cst_144 [2] : vector<2x8x8xf32> to vector<2x8xf32>
    %253 = vector.shape_cast %252 : vector<2x8xf32> to vector<2x8x1xf32>
    %254 = vector.broadcast %253 : vector<2x8x1xf32> to vector<2x8x8xf32>
    %255 = arith.subf %251, %254 : vector<2x8x8xf32>
    %256 = math.exp %255 : vector<2x8x8xf32>
    %cst_145 = arith.constant dense<0.000000e+00> : vector<2x8xf32>
    %257 = vector.multi_reduction <add>, %256, %cst_145 [2] : vector<2x8x8xf32> to vector<2x8xf32>
    %258 = vector.shape_cast %257 : vector<2x8xf32> to vector<2x8x1xf32>
    %259 = tpu.reciprocal %258 {approx = true} : vector<2x8x1xf32> -> vector<2x8x1xf32>
    %260 = vector.broadcast %259 : vector<2x8x1xf32> to vector<2x8x8xf32>
    %261 = arith.mulf %256, %260 : vector<2x8x8xf32>
    %262 = arith.truncf %261 : vector<2x8x8xf32> to vector<2x8x8xbf16>
    %263 = arith.truncf %245 : vector<2x8x16xf32> to vector<2x8x16xbf16>
    "tpu.trace_start"() <{level = 10 : i32, message = "bqk,bkd->bqd"}> : () -> ()
    %cst_146 = arith.constant dense<0.000000e+00> : vector<2x8x16xf32>
    %264 = tpu.matmul %262, %263, %cst_146 {dimension_numbers = #tpu.dot_dimension_numbers<[2], [1], [1], [2], [0, 0, 0, 1, 1, 2], [0], [0]>} : vector<2x8x8xbf16>, vector<2x8x16xbf16>, vector<2x8x16xf32> -> vector<2x8x16xf32>
    "tpu.trace_stop"() : () -> ()
    %265 = vector.shape_cast %264 : vector<2x8x16xf32> to vector<16x16xf32>
    %266 = arith.truncf %265 : vector<16x16xf32> to vector<16x16xbf16>
    %c1_147 = arith.constant 1 : index
    %c0_148 = arith.constant 0 : index
    %c0_149 = arith.constant 0 : index
    %c0_150 = arith.constant 0 : index
    %267 = vector.load %arg5[%c1_147, %c0_148, %c0_149, %c0_150] : memref<2x2x16x32xbf16, #tpu.memory_space<vmem>>, vector<1x1x16x32xbf16>
    %268 = vector.shape_cast %267 : vector<1x1x16x32xbf16> to vector<16x32xbf16>
    %cst_151 = arith.constant dense<0.000000e+00> : vector<16x32xf32>
    %269 = tpu.matmul %266, %268, %cst_151 {dimension_numbers = #tpu.dot_dimension_numbers<[1], [0], [0], [1], [0, 0, 1, 1], [], []>} : vector<16x16xbf16>, vector<16x32xbf16>, vector<16x32xf32> -> vector<16x32xf32>
    %270 = arith.addf %221, %269 : vector<16x32xf32>
    %c1_152 = arith.constant 1 : index
    %c1_153 = arith.constant 1 : index
    %c0_154 = arith.constant 0 : index
    %c0_155 = arith.constant 0 : index
    %271 = vector.load %arg3[%c1_152, %c1_153, %c0_154, %c0_155] : memref<2x6x32x16xbf16, #tpu.memory_space<vmem>>, vector<1x1x32x16xbf16>
    %272 = vector.shape_cast %271 : vector<1x1x32x16xbf16> to vector<32x16xbf16>
    %cst_156 = arith.constant dense<0.000000e+00> : vector<16x16xf32>
    %273 = tpu.matmul %220, %272, %cst_156 {dimension_numbers = #tpu.dot_dimension_numbers<[1], [0], [0], [1], [0, 0, 1, 1], [], []>} : vector<16x32xbf16>, vector<32x16xbf16>, vector<16x16xf32> -> vector<16x16xf32>
    %c1_157 = arith.constant 1 : index
    %c1_158 = arith.constant 1 : index
    %c0_159 = arith.constant 0 : index
    %c0_160 = arith.constant 0 : index
    %274 = vector.load %arg4[%c1_157, %c1_158, %c0_159, %c0_160] : memref<2x6x1x16xf32, #tpu.memory_space<vmem>>, vector<1x1x1x16xf32>
    %275 = vector.shape_cast %274 : vector<1x1x1x16xf32> to vector<1x16xf32>
    %276 = vector.broadcast %275 : vector<1x16xf32> to vector<16x16xf32>
    %277 = arith.addf %273, %276 : vector<16x16xf32>
    %278 = vector.shape_cast %277 : vector<16x16xf32> to vector<2x8x16xf32>
    %c1_161 = arith.constant 1 : index
    %c3_162 = arith.constant 3 : index
    %c0_163 = arith.constant 0 : index
    %c0_164 = arith.constant 0 : index
    %279 = vector.load %arg3[%c1_161, %c3_162, %c0_163, %c0_164] : memref<2x6x32x16xbf16, #tpu.memory_space<vmem>>, vector<1x1x32x16xbf16>
    %280 = vector.shape_cast %279 : vector<1x1x32x16xbf16> to vector<32x16xbf16>
    %cst_165 = arith.constant dense<0.000000e+00> : vector<16x16xf32>
    %281 = tpu.matmul %220, %280, %cst_165 {dimension_numbers = #tpu.dot_dimension_numbers<[1], [0], [0], [1], [0, 0, 1, 1], [], []>} : vector<16x32xbf16>, vector<32x16xbf16>, vector<16x16xf32> -> vector<16x16xf32>
    %c1_166 = arith.constant 1 : index
    %c3_167 = arith.constant 3 : index
    %c0_168 = arith.constant 0 : index
    %c0_169 = arith.constant 0 : index
    %282 = vector.load %arg4[%c1_166, %c3_167, %c0_168, %c0_169] : memref<2x6x1x16xf32, #tpu.memory_space<vmem>>, vector<1x1x1x16xf32>
    %283 = vector.shape_cast %282 : vector<1x1x1x16xf32> to vector<1x16xf32>
    %284 = vector.broadcast %283 : vector<1x16xf32> to vector<16x16xf32>
    %285 = arith.addf %281, %284 : vector<16x16xf32>
    %286 = vector.shape_cast %285 : vector<16x16xf32> to vector<2x8x16xf32>
    %c1_170 = arith.constant 1 : index
    %c5_171 = arith.constant 5 : index
    %c0_172 = arith.constant 0 : index
    %c0_173 = arith.constant 0 : index
    %287 = vector.load %arg3[%c1_170, %c5_171, %c0_172, %c0_173] : memref<2x6x32x16xbf16, #tpu.memory_space<vmem>>, vector<1x1x32x16xbf16>
    %288 = vector.shape_cast %287 : vector<1x1x32x16xbf16> to vector<32x16xbf16>
    %cst_174 = arith.constant dense<0.000000e+00> : vector<16x16xf32>
    %289 = tpu.matmul %220, %288, %cst_174 {dimension_numbers = #tpu.dot_dimension_numbers<[1], [0], [0], [1], [0, 0, 1, 1], [], []>} : vector<16x32xbf16>, vector<32x16xbf16>, vector<16x16xf32> -> vector<16x16xf32>
    %c1_175 = arith.constant 1 : index
    %c5_176 = arith.constant 5 : index
    %c0_177 = arith.constant 0 : index
    %c0_178 = arith.constant 0 : index
    %290 = vector.load %arg4[%c1_175, %c5_176, %c0_177, %c0_178] : memref<2x6x1x16xf32, #tpu.memory_space<vmem>>, vector<1x1x1x16xf32>
    %291 = vector.shape_cast %290 : vector<1x1x1x16xf32> to vector<1x16xf32>
    %292 = vector.broadcast %291 : vector<1x16xf32> to vector<16x16xf32>
    %293 = arith.addf %289, %292 : vector<16x16xf32>
    %294 = vector.shape_cast %293 : vector<16x16xf32> to vector<2x8x16xf32>
    %295 = arith.truncf %278 : vector<2x8x16xf32> to vector<2x8x16xbf16>
    %296 = arith.truncf %286 : vector<2x8x16xf32> to vector<2x8x16xbf16>
    "tpu.trace_start"() <{level = 10 : i32, message = "bqd,bkd->bqk"}> : () -> ()
    %cst_179 = arith.constant dense<0.000000e+00> : vector<2x8x8xf32>
    %297 = tpu.matmul %295, %296, %cst_179 {dimension_numbers = #tpu.dot_dimension_numbers<[2], [2], [1], [1], [0, 0, 0, 1, 1, 1], [0], [0]>} : vector<2x8x16xbf16>, vector<2x8x16xbf16>, vector<2x8x8xf32> -> vector<2x8x8xf32>
    "tpu.trace_stop"() : () -> ()
    %cst_180 = arith.constant 2.500000e-01 : f32
    %298 = vector.broadcast %cst_180 : f32 to vector<2x8x8xf32>
    %299 = arith.mulf %297, %298 : vector<2x8x8xf32>
    %300 = arith.addf %299, %2 : vector<2x8x8xf32>
    %cst_181 = arith.constant dense<0xFF800000> : vector<2x8xf32>
    %301 = vector.multi_reduction <maximumf>, %300, %cst_181 [2] : vector<2x8x8xf32> to vector<2x8xf32>
    %302 = vector.shape_cast %301 : vector<2x8xf32> to vector<2x8x1xf32>
    %303 = vector.broadcast %302 : vector<2x8x1xf32> to vector<2x8x8xf32>
    %304 = arith.subf %300, %303 : vector<2x8x8xf32>
    %305 = math.exp %304 : vector<2x8x8xf32>
    %cst_182 = arith.constant dense<0.000000e+00> : vector<2x8xf32>
    %306 = vector.multi_reduction <add>, %305, %cst_182 [2] : vector<2x8x8xf32> to vector<2x8xf32>
    %307 = vector.shape_cast %306 : vector<2x8xf32> to vector<2x8x1xf32>
    %308 = tpu.reciprocal %307 {approx = true} : vector<2x8x1xf32> -> vector<2x8x1xf32>
    %309 = vector.broadcast %308 : vector<2x8x1xf32> to vector<2x8x8xf32>
    %310 = arith.mulf %305, %309 : vector<2x8x8xf32>
    %311 = arith.truncf %310 : vector<2x8x8xf32> to vector<2x8x8xbf16>
    %312 = arith.truncf %294 : vector<2x8x16xf32> to vector<2x8x16xbf16>
    "tpu.trace_start"() <{level = 10 : i32, message = "bqk,bkd->bqd"}> : () -> ()
    %cst_183 = arith.constant dense<0.000000e+00> : vector<2x8x16xf32>
    %313 = tpu.matmul %311, %312, %cst_183 {dimension_numbers = #tpu.dot_dimension_numbers<[2], [1], [1], [2], [0, 0, 0, 1, 1, 2], [0], [0]>} : vector<2x8x8xbf16>, vector<2x8x16xbf16>, vector<2x8x16xf32> -> vector<2x8x16xf32>
    "tpu.trace_stop"() : () -> ()
    %314 = vector.shape_cast %313 : vector<2x8x16xf32> to vector<16x16xf32>
    %315 = arith.truncf %314 : vector<16x16xf32> to vector<16x16xbf16>
    %c1_184 = arith.constant 1 : index
    %c1_185 = arith.constant 1 : index
    %c0_186 = arith.constant 0 : index
    %c0_187 = arith.constant 0 : index
    %316 = vector.load %arg5[%c1_184, %c1_185, %c0_186, %c0_187] : memref<2x2x16x32xbf16, #tpu.memory_space<vmem>>, vector<1x1x16x32xbf16>
    %317 = vector.shape_cast %316 : vector<1x1x16x32xbf16> to vector<16x32xbf16>
    %cst_188 = arith.constant dense<0.000000e+00> : vector<16x32xf32>
    %318 = tpu.matmul %315, %317, %cst_188 {dimension_numbers = #tpu.dot_dimension_numbers<[1], [0], [0], [1], [0, 0, 1, 1], [], []>} : vector<16x16xbf16>, vector<16x32xbf16>, vector<16x32xf32> -> vector<16x32xf32>
    %319 = arith.addf %270, %318 : vector<16x32xf32>
    %320 = arith.addf %211, %319 : vector<16x32xf32>
    %321 = vector.broadcast %214 : vector<1x32xf32> to vector<16x32xf32>
    %322 = arith.addf %320, %321 : vector<16x32xf32>
    %cst_189 = arith.constant dense<0.000000e+00> : vector<16xf32>
    %323 = vector.multi_reduction <add>, %322, %cst_189 [1] : vector<16x32xf32> to vector<16xf32>
    %324 = vector.shape_cast %323 : vector<16xf32> to vector<16x1xf32>
    %cst_190 = arith.constant 3.200000e+01 : f32
    %325 = vector.broadcast %cst_190 : f32 to vector<16x1xf32>
    %326 = arith.divf %324, %325 : vector<16x1xf32>
    %327 = vector.broadcast %326 : vector<16x1xf32> to vector<16x32xf32>
    %328 = arith.subf %322, %327 : vector<16x32xf32>
    %329 = arith.mulf %328, %328 : vector<16x32xf32>
    %cst_191 = arith.constant dense<0.000000e+00> : vector<16xf32>
    %330 = vector.multi_reduction <add>, %329, %cst_191 [1] : vector<16x32xf32> to vector<16xf32>
    %331 = vector.shape_cast %330 : vector<16xf32> to vector<16x1xf32>
    %cst_192 = arith.constant 3.200000e+01 : f32
    %332 = vector.broadcast %cst_192 : f32 to vector<16x1xf32>
    %333 = arith.divf %331, %332 : vector<16x1xf32>
    %334 = vector.broadcast %326 : vector<16x1xf32> to vector<16x32xf32>
    %335 = arith.subf %322, %334 : vector<16x32xf32>
    %cst_193 = arith.constant 9.99999996E-13 : f32
    %336 = vector.broadcast %cst_193 : f32 to vector<16x1xf32>
    %337 = arith.addf %333, %336 : vector<16x1xf32>
    %338 = math.rsqrt %337 : vector<16x1xf32>
    %339 = vector.broadcast %338 : vector<16x1xf32> to vector<16x32xf32>
    %340 = arith.mulf %335, %339 : vector<16x32xf32>
    %341 = vector.broadcast %216 : vector<1x32xf32> to vector<16x32xf32>
    %342 = arith.mulf %340, %341 : vector<16x32xf32>
    %343 = vector.broadcast %217 : vector<1x32xf32> to vector<16x32xf32>
    %344 = arith.addf %342, %343 : vector<16x32xf32>
    %345 = arith.truncf %344 : vector<16x32xf32> to vector<16x32xbf16>
    %c1_194 = arith.constant 1 : index
    %c0_195 = arith.constant 0 : index
    %c0_196 = arith.constant 0 : index
    %346 = vector.load %arg6[%c1_194, %c0_195, %c0_196] : memref<2x32x128xbf16, #tpu.memory_space<vmem>>, vector<1x32x128xbf16>
    %347 = vector.shape_cast %346 : vector<1x32x128xbf16> to vector<32x128xbf16>
    %cst_197 = arith.constant dense<0.000000e+00> : vector<16x128xf32>
    %348 = tpu.matmul %345, %347, %cst_197 {dimension_numbers = #tpu.dot_dimension_numbers<[1], [0], [0], [1], [0, 0, 1, 1], [], []>} : vector<16x32xbf16>, vector<32x128xbf16>, vector<16x128xf32> -> vector<16x128xf32>
    %c1_198 = arith.constant 1 : index
    %c0_199 = arith.constant 0 : index
    %c0_200 = arith.constant 0 : index
    %349 = vector.load %arg7[%c1_198, %c0_199, %c0_200] : memref<2x1x128xf32, #tpu.memory_space<vmem>>, vector<1x1x128xf32>
    %350 = vector.shape_cast %349 : vector<1x1x128xf32> to vector<1x128xf32>
    %351 = vector.broadcast %350 : vector<1x128xf32> to vector<16x128xf32>
    %352 = arith.addf %348, %351 : vector<16x128xf32>
    %cst_201 = arith.constant 5.000000e-01 : f32
    %353 = vector.broadcast %cst_201 : f32 to vector<16x128xf32>
    %354 = arith.mulf %353, %352 : vector<16x128xf32>
    %cst_202 = arith.constant 4.471500e-02 : f32
    %355 = vector.broadcast %cst_202 : f32 to vector<16x128xf32>
    %356 = arith.mulf %355, %352 : vector<16x128xf32>
    %357 = arith.mulf %356, %352 : vector<16x128xf32>
    %358 = arith.mulf %357, %352 : vector<16x128xf32>
    %359 = arith.addf %352, %358 : vector<16x128xf32>
    %cst_203 = arith.constant 0.797884583 : f32
    %360 = vector.broadcast %cst_203 : f32 to vector<16x128xf32>
    %361 = arith.mulf %360, %359 : vector<16x128xf32>
    %362 = math.tanh %361 : vector<16x128xf32>
    %cst_204 = arith.constant 1.000000e+00 : f32
    %363 = vector.broadcast %cst_204 : f32 to vector<16x128xf32>
    %364 = arith.addf %363, %362 : vector<16x128xf32>
    %365 = arith.mulf %354, %364 : vector<16x128xf32>
    %366 = arith.truncf %365 : vector<16x128xf32> to vector<16x128xbf16>
    %c1_205 = arith.constant 1 : index
    %c0_206 = arith.constant 0 : index
    %c0_207 = arith.constant 0 : index
    %367 = vector.load %arg8[%c1_205, %c0_206, %c0_207] : memref<2x128x32xbf16, #tpu.memory_space<vmem>>, vector<1x128x32xbf16>
    %368 = vector.shape_cast %367 : vector<1x128x32xbf16> to vector<128x32xbf16>
    %cst_208 = arith.constant dense<0.000000e+00> : vector<16x32xf32>
    %369 = tpu.matmul %366, %368, %cst_208 {dimension_numbers = #tpu.dot_dimension_numbers<[1], [0], [0], [1], [0, 0, 1, 1], [], []>} : vector<16x128xbf16>, vector<128x32xbf16>, vector<16x32xf32> -> vector<16x32xf32>
    %370 = vector.broadcast %215 : vector<1x32xf32> to vector<16x32xf32>
    %371 = arith.addf %369, %370 : vector<16x32xf32>
    %372 = arith.addf %344, %371 : vector<16x32xf32>
    %cst_209 = arith.constant dense<0.000000e+00> : vector<16xf32>
    %373 = vector.multi_reduction <add>, %372, %cst_209 [1] : vector<16x32xf32> to vector<16xf32>
    %374 = vector.shape_cast %373 : vector<16xf32> to vector<16x1xf32>
    %cst_210 = arith.constant 3.200000e+01 : f32
    %375 = vector.broadcast %cst_210 : f32 to vector<16x1xf32>
    %376 = arith.divf %374, %375 : vector<16x1xf32>
    %377 = vector.broadcast %376 : vector<16x1xf32> to vector<16x32xf32>
    %378 = arith.subf %372, %377 : vector<16x32xf32>
    %379 = arith.mulf %378, %378 : vector<16x32xf32>
    %cst_211 = arith.constant dense<0.000000e+00> : vector<16xf32>
    %380 = vector.multi_reduction <add>, %379, %cst_211 [1] : vector<16x32xf32> to vector<16xf32>
    %381 = vector.shape_cast %380 : vector<16xf32> to vector<16x1xf32>
    %cst_212 = arith.constant 3.200000e+01 : f32
    %382 = vector.broadcast %cst_212 : f32 to vector<16x1xf32>
    %383 = arith.divf %381, %382 : vector<16x1xf32>
    %384 = vector.broadcast %376 : vector<16x1xf32> to vector<16x32xf32>
    %385 = arith.subf %372, %384 : vector<16x32xf32>
    %cst_213 = arith.constant 9.99999996E-13 : f32
    %386 = vector.broadcast %cst_213 : f32 to vector<16x1xf32>
    %387 = arith.addf %383, %386 : vector<16x1xf32>
    %388 = math.rsqrt %387 : vector<16x1xf32>
    %389 = vector.broadcast %388 : vector<16x1xf32> to vector<16x32xf32>
    %390 = arith.mulf %385, %389 : vector<16x32xf32>
    %391 = vector.broadcast %218 : vector<1x32xf32> to vector<16x32xf32>
    %392 = arith.mulf %390, %391 : vector<16x32xf32>
    %393 = vector.broadcast %219 : vector<1x32xf32> to vector<16x32xf32>
    %394 = arith.addf %392, %393 : vector<16x32xf32>
    %395 = vector.shape_cast %394 : vector<16x32xf32> to vector<2x8x32xf32>
    %cst_214 = arith.constant dense<0.000000e+00> : vector<2x32xf32>
    %396 = vector.multi_reduction <add>, %395, %cst_214 [1] : vector<2x8x32xf32> to vector<2x32xf32>
    %cst_215 = arith.constant 8.000000e+00 : f32
    %397 = vector.broadcast %cst_215 : f32 to vector<2x32xf32>
    %398 = arith.divf %396, %397 : vector<2x32xf32>
    %399 = arith.truncf %398 : vector<2x32xf32> to vector<2x32xbf16>
    %c0_216 = arith.constant 0 : index
    %c0_217 = arith.constant 0 : index
    %400 = vector.load %arg10[%c0_216, %c0_217] : memref<32x6xbf16, #tpu.memory_space<vmem>>, vector<32x6xbf16>
    %cst_218 = arith.constant dense<0.000000e+00> : vector<2x6xf32>
    %401 = tpu.matmul %399, %400, %cst_218 {dimension_numbers = #tpu.dot_dimension_numbers<[1], [0], [0], [1], [0, 0, 1, 1], [], []>} : vector<2x32xbf16>, vector<32x6xbf16>, vector<2x6xf32> -> vector<2x6xf32>
    %c0_219 = arith.constant 0 : index
    %c0_220 = arith.constant 0 : index
    %402 = vector.load %arg11[%c0_219, %c0_220] : memref<1x6xf32, #tpu.memory_space<vmem>>, vector<1x6xf32>
    %403 = vector.broadcast %402 : vector<1x6xf32> to vector<2x6xf32>
    %404 = arith.addf %401, %403 : vector<2x6xf32>
    %c0_221 = arith.constant 0 : index
    %c0_222 = arith.constant 0 : index
    %405 = vector.load %arg12[%c0_221, %c0_222] : memref<2x6xf32, #tpu.memory_space<vmem>>, vector<2x6xf32>
    tpu.vector_store %arg12[%c0_221, %c0_222], %404 {strides = array<i32>} : memref<2x6xf32, #tpu.memory_space<vmem>>, vector<2x6xf32>,
    return
  }
}

</mosaic_0001>

<bundles_post_ra>
// kernel: multitask_forward.1
= control target key start
LH: loop header
LB: loop body
LE: loop exit
PB: predicated region body
PF: predicated region fallthrough
CT: control target
= control target key end

     0   :  { %vm60_vm0 = vcmask 261120   ;;  %v3340_v15 = vmov 0.0   ;;  %vm3341_vm1 = vmmov 0   ;;  %vm305_vm2 = vcmask 130048   ;;  %s3988_s0 = inlined_call_operand.vmem [shape: f32[2,8,32], index: 0, kind: input, shape index: {}]   ;;  %s3989_s3 = inlined_call_operand.vmem [shape: bf16[2,6,32,16], index: 3, kind: input, shape index: {}]   ;;  %s3990_s2 = inlined_call_operand.vmem [shape: f32[2,32], index: 2, kind: input, shape index: {}]   ;;  %s3991_s4 = inlined_call_operand.vmem [shape: f32[2,6,1,16], index: 4, kind: input, shape index: {}]   ;;  %s3992_s1 = inlined_call_operand.vmem [shape: f32[2,1,8], index: 1, kind: input, shape index: {}]   ;;  %s3993_s5 = inlined_call_operand.vmem [shape: bf16[2,2,16,32], index: 5, kind: input, shape index: {}]   ;;  %s3994_s9 = inlined_call_operand.vmem [shape: f32[2,6,32], index: 9, kind: input, shape index: {}]   ;;  %s3995_s6 = inlined_call_operand.vmem [shape: bf16[2,32,128], index: 6, kind: input, shape index: {}]   ;;  %s3996_s8 = inlined_call_operand.vmem [shape: bf16[2,128,32], index: 8, kind: input, shape index: {}]   ;;  %s3997_s7 = inlined_call_operand.vmem [shape: f32[2,1,128], index: 7, kind: input, shape index: {}]   ;;  %s3998_s10 = inlined_call_operand.vmem [shape: bf16[32,6], index: 10, kind: input, shape index: {}]   ;;  %s3999_s11 = inlined_call_operand.vmem [shape: f32[1,6], index: 11, kind: input, shape index: {}]   ;;  %s4000_s12 = inlined_call_operand.vmem [shape: f32[2,6], index: 12, kind: output, shape index: {}]  }
   0x1   :  { %v56_v0 = vld [vmem:[%s3988_s0] sm:$0xff]  ;;  %v57_v1 = vld [vmem:[%s3988_s0 + $0x8] sm:$0xff]  ;;  %2946 = vmatprep.subr.bf16.mxu1 %v3340_v15  ;;  %2962 = vmatprep.subr.bf16.mxu0 %v3340_v15  ;;  %vm432_vm3 = vcmask 1043456   ;;  %vm402_vm4 = vcmask 64512   ;;  %vm2592_vm5 = vcmask 1041409   ;;  %vm2650_vm6 = vcmask 41984  }
   0x2   :  { %v61_v2 = vsel %vm60_vm0, %v56_v0, 0.0  ;;  %v64_v3 = vsel %vm60_vm0, %v57_v1, 0.0  ;;  %v3228_v14 = vld [vmem:[%s3989_s3] sm:$0xff]   ;;  %v3230_v17 = vld [vmem:[%s3989_s3 + $0x8] sm:$0xff]   ;;  %2950 = vmatprep.mubr.msk.bf16.mxu1 %vm3341_vm1, %v3340_v15  ;;  %2966 = vmatprep.mubr.msk.bf16.mxu0 %vm3341_vm1, %v3340_v15 }
   0x3   :  { %62 = vadd.xlane.f32.xlu0 %v61_v2  ;;  %v3229_v16 = vld [vmem:[%s3989_s3 + $0x40] sm:$0xff]   ;;  %2947 = vmatpush3.bf16.msra.mxu1 %v3228_v14  ;;  %v3231_v18 = vld [vmem:[%s3989_s3 + $0x48] sm:$0xff]  }
   0x4   :  { %2963 = vmatpush3.bf16.msra.mxu0 %v3229_v16  ;;  %2948 = vmatprep.subr.bf16.mxu1 %v3340_v15  ;;  %v2658_v27 = vld [vmem:[%s3990_s2] ss:$0 sm:$0xff]  ;;  %v2659_v31 = vld [vmem:[%s3990_s2 + $0x1] ss:$0 sm:$0xff]  ;;  %v3233_v37 = vld [vmem:[%s3989_s3 + $0x28] sm:$0xff]  }
   0x5   :  { %2964 = vmatprep.subr.bf16.mxu0 %v3340_v15  ;;  %v3232_v35 = vld [vmem:[%s3989_s3 + $0x20] sm:$0xff]  }
   0x6   :  { %v2669_v46 = vld [vmem:[%s3991_s4 + $0x2] ss:$0 sm:$0xff]  ;;  %v2678_v50 = vld [vmem:[%s3991_s4 + $0x4] ss:$0 sm:$0xff]  ;;  %v2660_v55 = vld [vmem:[%s3991_s4] ss:$0 sm:$0xff] }
   0x7   :  { %65 = vadd.xlane.f32.xlu0 %v64_v3  ;;  %2949 = vmatpush3.bf16.msra.mxu1 %v3230_v17 }
   0x8   :  { %2965 = vmatpush3.bf16.msra.mxu0 %v3231_v18  ;;  %2954 = vmatprep.subr.bf16.mxu1 %v3340_v15 }
   0x9   :  { %2976 = vmatprep.subr.bf16.mxu0 %v3340_v15 }
  0x90   :  { %v63_v4 = vpop.xlane.xlu0 %62 }
  0x91   :  { %v68_v5 = vmul.f32 0.03125, %v63_v4 }
  0x93   :  { %v70_v6 = vsub.f32 %v56_v0, %v68_v5 }
  0x94   :  { %v66_v7 = vpop.xlane.xlu0 %65 }
  0x95   :  { %v69_v8 = vmul.f32 0.03125, %v66_v7  ;;  %v72_v9 = vmul.f32 %v70_v6, %v70_v6 }
  0x97   :  { %v71_v10 = vsub.f32 %v57_v1, %v69_v8  ;;  %v74_v11 = vsel %vm60_vm0, %v72_v9, 0.0 }
  0x98   :  { %75 = vadd.xlane.f32.xlu1 %v74_v11  ;;  %v3504_v11 = vld [vmem:[%s3992_s1 + $0x1] ss:$0 sm:$0xff] }
  0x99   :  { %v73_v12 = vmul.f32 %v71_v10, %v71_v10 }
  0x9b   :  { %v77_v13 = vsel %vm60_vm0, %v73_v12, 0.0 }
  0x9c   :  { %78 = vadd.xlane.f32.xlu1 %v77_v13 }
 0x125   :  { %v76_v19 = vpop.xlane.xlu1 %75 }
 0x126   :  { %v80_v20 = vmul.f32 0.03125, %v76_v19 }
 0x128   :  { %v82_v21 = vadd.f32 1e-12, %v80_v20 }
 0x129   :  { %v79_v22 = vpop.xlane.xlu1 %78 }
 0x12a   :  { %3278 = vrsqrt.f32 %v82_v21  ;;  %v81_v23 = vmul.f32 0.03125, %v79_v22 }
 0x12c   :  { %v83_v24 = vadd.f32 1e-12, %v81_v23 }
 0x12e   :  { %3280 = vrsqrt.f32 %v83_v24 }
 0x134   :  { %v3279_v25 = vpop.eup %3278 }
 0x135   :  { %v86_v26 = vmul.f32 %v3279_v25, %v70_v6  ;;  %v3499_v6 = vld [vmem:[%s3992_s1] ss:$0 sm:$0xff] }
 0x137   :  { %v92_v29 = vmul.f32 %v2658_v27, %v86_v26 }
 0x138   :  { %v3281_v28 = vpop.eup %3280 }
 0x139   :  { %v87_v30 = vmul.f32 %v3281_v28, %v71_v10  ;;  %v3445_v33 = vadd.f32 %v2659_v31, %v92_v29 }
 0x13b   :  { %v93_v32 = vmul.f32 %v2658_v27, %v87_v30 }
 0x13d   :  { %v3447_v34 = vadd.f32 %v2659_v31, %v93_v32 }
 0x13f   :  { %v3454_v36 = vpack.c.bf16 %v3447_v34, %v3445_v33 }
 0x141   :  { %2951 = vmatmul.mubr.msk.bf16.vlgmr.msra.gmra.mrb[0].mxu1 %vm60_vm0, %v3454_v36  ;;  %2967 = vmatmul.mubr.msk.bf16.vlgmr.msra.gmra.mrb[0].mxu0 %vm60_vm0, %v3454_v36 }
 0x142   :  { %2955 = vmatpush3.bf16.msra.mxu1 %v3232_v35  ;;  %2958 = vmatprep.mubr.msk.bf16.mxu1 %vm3341_vm1, %v3340_v15 }
 0x143   :  { %2956 = vmatprep.subr.bf16.mxu1 %v3340_v15  ;;  %2978 = vmatprep.mubr.msk.bf16.mxu0 %vm3341_vm1, %v3340_v15 }
 0x146   :  { %2957 = vmatpush3.bf16.msra.mxu1 %v3233_v37 }
 0x147   :  { %2970 = vmatprep.subr.bf16.mxu1 %v3340_v15 }
 0x149   :  { %2959 = vmatmul.mubr.msk.bf16.vlgmr.msra.gmra.mrb[4].mxu1 %vm60_vm0, %v3454_v36 }
 0x14a   :  { %2972 = vmatprep.mubr.msk.bf16.mxu1 %vm3341_vm1, %v3340_v15 }
 0x214   :  { %v162_v38 = vpop.f32.mrb[0].mxu1  ;;  %v294_v39 = vpop.f32.mrb[0].mxu0 }
 0x215   :  { %v2952_v40 = vpop.f32.mrb[1].mxu1  ;;  %v2968_v41 = vpop.f32.mrb[1].mxu0  ;;  %v295_v56 = vadd.f32 %v2678_v50, %v294_v39  ;;  %v163_v59 = vadd.f32 %v2660_v55, %v162_v38 }
 0x216   :  { %v165_v42 = vpop.f32.mrb[2].mxu1  ;;  %v297_v43 = vpop.f32.mrb[2].mxu0  ;;  %v3234_v40 = vld [vmem:[%s3989_s3 + $0x10] sm:$0xff]  }
 0x217   :  { %v2953_v44 = vpop.f32.mrb[3].mxu1  ;;  %v2969_v45 = vpop.f32.mrb[3].mxu0  ;;  %v298_v60 = vadd.f32 %v2678_v50, %v297_v43  ;;  %v427_v62 = vpack.c.bf16 %v295_v56, %v295_v56  ;;  %v166_v63 = vadd.f32 %v2660_v55, %v165_v42  ;;  %v301_v0 = vpack.c.bf16 %v163_v59, %v163_v59  ;;  %v3235_v43 = vld [vmem:[%s3989_s3 + $0x30] sm:$0xff]  }
 0x218   :  { %v3236_v45 = vld [vmem:[%s3989_s3 + $0x18] sm:$0xff]  }
 0x219   :  { %v428_v1 = vpack.c.bf16 %v298_v60, %v298_v60  ;;  %v434_v2 = vsel %vm432_vm3, %v427_v62, 0  ;;  %v302_v3 = vpack.c.bf16 %v166_v63, %v166_v63 }
 0x21b   :  { %v480_v4 = vsel %vm432_vm3, %v428_v1, 0 }
 0x21c   :  { %v228_v47 = vpop.f32.mrb[4].mxu1 }
 0x21d   :  { %v229_v48 = vadd.f32 %v2669_v46, %v228_v47  ;;  %v2960_v49 = vpop.f32.mrb[5].mxu1  ;;  %v3238_v47 = vld [vmem:[%s3989_s3 + $0x50] sm:$0xff]  }
 0x21e   :  { %v231_v51 = vpop.f32.mrb[6].mxu1 }
 0x21f   :  { %v303_v52 = vpack.c.bf16 %v229_v48, %v229_v48  ;;  %v232_v53 = vadd.f32 %v2669_v46, %v231_v51  ;;  %v2961_v54 = vpop.f32.mrb[7].mxu1  ;;  %v3237_v46 = vld [vmem:[%s3989_s3 + $0x38] sm:$0xff]  }
 0x220   :  { %v3239_v48 = vld [vmem:[%s3989_s3 + $0x58] sm:$0xff]  }
 0x221   :  { %v310_v57 = vsel %vm305_vm2, %v303_v52, 0  ;;  %v304_v58 = vpack.c.bf16 %v232_v53, %v232_v53 }
 0x222   :  { %2971 = vmatpush3.bf16.xpose.msra.mxu1 %v310_v57 }
 0x223   :  { %v356_v61 = vsel %vm305_vm2, %v304_v58, 0  ;;  %2982 = vmatprep.subr.bf16.mxu1 %v3340_v15 }
 0x224   :  { %2977 = vmatpush3.bf16.xpose.msra.mxu0 %v356_v61 }
 0x225   :  { %2988 = vmatprep.subr.bf16.mxu0 %v3340_v15 }
 0x229   :  { %2973 = vmatmul.mubr.msk.bf16.vlgmr.msra.gmra.mrb[8].mxu1 %vm305_vm2, %v301_v0 }
 0x22a   :  { %2983 = vmatpush3.bf16.msra.mxu1 %v434_v2  ;;  %2984 = vmatprep.mubr.msk.bf16.mxu1 %vm3341_vm1, %v3340_v15 }
 0x22b   :  { %2979 = vmatmul.mubr.msk.bf16.vlgmr.msra.gmra.mrb[4].mxu0 %vm305_vm2, %v302_v3  ;;  %2994 = vmatprep.subr.bf16.mxu1 %v3340_v15 }
 0x22c   :  { %2989 = vmatpush3.bf16.msra.mxu0 %v480_v4  ;;  %2990 = vmatprep.mubr.msk.bf16.mxu0 %vm3341_vm1, %v3340_v15 }
 0x22d   :  { %3002 = vmatprep.subr.bf16.mxu0 %v3340_v15 }
 0x2fc   :  { %v346_v5 = vpop.f32.mrb[8].mxu1 }
 0x2fd   :  { %v398_v7 = vmul.f32 0.25, %v346_v5  ;;  %v2974_v8 = vpop.f32.mrb[9].mxu1  ;;  %v2691_v5 = vld [vmem:[%s3991_s4 + $0x1] ss:$0 sm:$0xff] }
 0x2fe   :  { %v349_v9 = vpop.f32.mrb[10].mxu1  ;;  %v392_v10 = vpop.f32.mrb[4].mxu0 }
 0x2ff   :  { %v399_v12 = vmul.f32 0.25, %v392_v10  ;;  %v2975_v13 = vpop.f32.mrb[11].mxu1  ;;  %v2980_v14 = vpop.f32.mrb[5].mxu0  ;;  %v400_v16 = vadd.f32 %v3499_v6, %v398_v7  ;;  %v2709_v7 = vld [vmem:[%s3991_s4 + $0x5] ss:$0 sm:$0xff] }
 0x300   :  { %v395_v17 = vpop.f32.mrb[6].mxu0 }
 0x301   :  { %v2981_v18 = vpop.f32.mrb[7].mxu0  ;;  %v403_v19 = vsel %vm402_vm4, %v400_v16, -inf  ;;  %v401_v20 = vadd.f32 %v3504_v11, %v399_v12 }
 0x302   :  { %404 = vmax.xlane.f32.xlu1 %v403_v19 }
 0x303   :  { %v406_v21 = vsel %vm402_vm4, %v401_v20, -inf }
 0x304   :  { %407 = vmax.xlane.f32.xlu0 %v406_v21 }
 0x38f   :  { %v405_v22 = vpop.xlane.xlu1 %404 }
 0x390   :  { %v409_v23 = vsub.f32 %v400_v16, %v405_v22 }
 0x391   :  { %v408_v24 = vpop.xlane.xlu0 %407 }
 0x392   :  { %v411_v25 = vmul.f32 1.442695, %v409_v23  ;;  %v410_v26 = vsub.f32 %v401_v20, %v408_v24 }
 0x394   :  { %3282 = vpow2.f32 %v411_v25  ;;  %v413_v27 = vmul.f32 1.442695, %v410_v26 }
 0x396   :  { %3284 = vpow2.f32 %v413_v27 }
 0x39e   :  { %v3283_v28 = vpop.eup %3282 }
 0x39f   :  { %v415_v29 = vsel %vm402_vm4, %v3283_v28, 0.0 }
 0x3a0   :  { %v3285_v30 = vpop.eup %3284  ;;  %416 = vadd.xlane.f32.xlu1 %v415_v29 }
 0x3a1   :  { %v418_v31 = vsel %vm402_vm4, %v3285_v30, 0.0 }
 0x3a2   :  { %419 = vadd.xlane.f32.xlu0 %v418_v31 }
 0x42d   :  { %v417_v32 = vpop.xlane.xlu1 %416 }
 0x42e   :  { %3286 = vrcp.f32 %v417_v32 }
 0x42f   :  { %v420_v35 = vpop.xlane.xlu0 %419 }
 0x430   :  { %3288 = vrcp.f32 %v420_v35 }
 0x438   :  { %v3287_v37 = vpop.eup %3286 }
 0x439   :  { %v423_v38 = vmul.f32 %v3287_v37, %v3283_v28 }
 0x43a   :  { %v3289_v39 = vpop.eup %3288 }
 0x43b   :  { %v424_v41 = vmul.f32 %v3289_v39, %v3285_v30  ;;  %v425_v42 = vpack.c.bf16 %v423_v38, %v423_v38 }
 0x43d   :  { %2985 = vmatmul.mubr.msk.bf16.vlgmr.msra.gmra.mrb[12].mxu1 %vm402_vm4, %v425_v42  ;;  %v426_v44 = vpack.c.bf16 %v424_v41, %v424_v41 }
 0x43e   :  { %2995 = vmatpush3.bf16.msra.mxu1 %v3234_v40  ;;  %2998 = vmatprep.mubr.msk.bf16.mxu1 %vm3341_vm1, %v3340_v15 }
 0x43f   :  { %2991 = vmatmul.mubr.msk.bf16.vlgmr.msra.gmra.mrb[8].mxu0 %vm402_vm4, %v426_v44  ;;  %2996 = vmatprep.subr.bf16.mxu1 %v3340_v15 }
 0x440   :  { %3003 = vmatpush3.bf16.msra.mxu0 %v3235_v43  ;;  %3006 = vmatprep.mubr.msk.bf16.mxu0 %vm3341_vm1, %v3340_v15 }
 0x441   :  { %3004 = vmatprep.subr.bf16.mxu0 %v3340_v15 }
 0x442   :  { %2997 = vmatpush3.bf16.msra.mxu1 %v3236_v45 }
 0x443   :  { %3010 = vmatprep.subr.bf16.mxu1 %v3340_v15 }
 0x444   :  { %3005 = vmatpush3.bf16.msra.mxu0 %v3237_v46 }
 0x445   :  { %2999 = vmatmul.mubr.msk.bf16.vlgmr.msra.gmra.mrb[16].mxu1 %vm60_vm0, %v3454_v36  ;;  %3018 = vmatprep.subr.bf16.mxu0 %v3340_v15 }
 0x446   :  { %3011 = vmatpush3.bf16.msra.mxu1 %v3238_v47  ;;  %3014 = vmatprep.mubr.msk.bf16.mxu1 %vm3341_vm1, %v3340_v15 }
 0x447   :  { %3007 = vmatmul.mubr.msk.bf16.vlgmr.msra.gmra.mrb[12].mxu0 %vm60_vm0, %v3454_v36  ;;  %3012 = vmatprep.subr.bf16.mxu1 %v3340_v15 }
 0x448   :  { %3020 = vmatprep.mubr.msk.bf16.mxu0 %vm3341_vm1, %v3340_v15 }
 0x44a   :  { %3013 = vmatpush3.bf16.msra.mxu1 %v3239_v48 }
 0x44b   :  { %3024 = vmatprep.subr.bf16.mxu1 %v3340_v15 }
 0x44d   :  { %3015 = vmatmul.mubr.msk.bf16.vlgmr.msra.gmra.mrb[20].mxu1 %vm60_vm0, %v3454_v36  ;;  %v2700_v36 = vld [vmem:[%s3991_s4 + $0x3] ss:$0 sm:$0xff] }
 0x44e   :  { %3026 = vmatprep.mubr.msk.bf16.mxu1 %vm3341_vm1, %v3340_v15 }
 0x510   :  { %v3554_v49 = vpop.f32.mrb[12].mxu1 }
 0x511   :  { %v2986_v50 = vpop.f32.mrb[13].mxu1 }
 0x512   :  { %v473_v51 = vpop.f32.mrb[14].mxu1  ;;  %v3556_v52 = vpop.f32.mrb[8].mxu0 }
 0x513   :  { %v522_v53 = vpack.c.bf16 %v3556_v52, %v3554_v49  ;;  %v2987_v54 = vpop.f32.mrb[15].mxu1  ;;  %v2992_v55 = vpop.f32.mrb[9].mxu0 }
 0x514   :  { %v519_v56 = vpop.f32.mrb[10].mxu0 }
 0x515   :  { %v2993_v57 = vpop.f32.mrb[11].mxu0 }
 0x518   :  { %v584_v58 = vpop.f32.mrb[16].mxu1 }
 0x519   :  { %v3000_v59 = vpop.f32.mrb[17].mxu1  ;;  %v585_v12 = vadd.f32 %v2691_v5, %v584_v58 }
 0x51a   :  { %v587_v60 = vpop.f32.mrb[18].mxu1  ;;  %v650_v61 = vpop.f32.mrb[12].mxu0 }
 0x51b   :  { %v651_v62 = vadd.f32 %v2700_v36, %v650_v61  ;;  %v3001_v63 = vpop.f32.mrb[19].mxu1  ;;  %v3008_v0 = vpop.f32.mrb[13].mxu0  ;;  %v588_v18 = vadd.f32 %v2691_v5, %v587_v60  ;;  %v723_v22 = vpack.c.bf16 %v585_v12, %v585_v12  ;;  %v3241_v61 = vld [vmem:[%s3993_s5 + $0x8] sm:$0xff]  }
 0x51c   :  { %v653_v1 = vpop.f32.mrb[14].mxu0  ;;  %v3240_v0 = vld [vmem:[%s3993_s5] sm:$0xff]  }
 0x51d   :  { %v725_v2 = vpack.c.bf16 %v651_v62, %v651_v62  ;;  %v654_v3 = vadd.f32 %v2700_v36, %v653_v1  ;;  %v3009_v4 = vpop.f32.mrb[15].mxu0  ;;  %v724_v24 = vpack.c.bf16 %v588_v18, %v588_v18  ;;  %v3618_v18 = vld [vmem:[%s3994_s9] sm:$0x3f] }
 0x51f   :  { %v731_v8 = vsel %vm305_vm2, %v725_v2, 0  ;;  %v726_v9 = vpack.c.bf16 %v654_v3, %v654_v3 }
 0x520   :  { %v716_v10 = vpop.f32.mrb[20].mxu1  ;;  %3019 = vmatpush3.bf16.xpose.msra.mxu0 %v731_v8 }
 0x521   :  { %v777_v13 = vsel %vm305_vm2, %v726_v9, 0  ;;  %v717_v14 = vadd.f32 %v2709_v7, %v716_v10  ;;  %v3016_v16 = vpop.f32.mrb[21].mxu1  ;;  %3030 = vmatprep.subr.bf16.mxu0 %v3340_v15 }
 0x522   :  { %v719_v17 = vpop.f32.mrb[22].mxu1  ;;  %3025 = vmatpush3.bf16.xpose.msra.mxu1 %v777_v13 }
 0x523   :  { %v847_v19 = vpack.c.bf16 %v717_v14, %v717_v14  ;;  %v720_v20 = vadd.f32 %v2709_v7, %v719_v17  ;;  %v3017_v21 = vpop.f32.mrb[23].mxu1  ;;  %3036 = vmatprep.subr.bf16.mxu1 %v3340_v15  ;;  %v1047_v14 = vlaneseq }
 0x525   :  { %v848_v23 = vpack.c.bf16 %v720_v20, %v720_v20  ;;  %v853_v25 = vsel %vm432_vm3, %v847_v19, 0  ;;  %v3612_v16 = vshrl.u32 %v1047_v14, 7 }
 0x527   :  { %3021 = vmatmul.mubr.msk.bf16.vlgmr.msra.gmra.mrb[16].mxu0 %vm305_vm2, %v723_v22  ;;  %v899_v26 = vsel %vm432_vm3, %v848_v23, 0  ;;  %v1049_v17 = vsub.s32 0, %v3612_v16 }
 0x528   :  { %3031 = vmatpush3.bf16.msra.mxu0 %v853_v25  ;;  %3032 = vmatprep.mubr.msk.bf16.mxu0 %vm3341_vm1, %v3340_v15 }
 0x529   :  { %3027 = vmatmul.mubr.msk.bf16.vlgmr.msra.gmra.mrb[24].mxu1 %vm305_vm2, %v724_v24  ;;  %3042 = vmatprep.subr.bf16.mxu0 %v3340_v15  ;;  %v1050_v22 = vrot.slane %v3618_v18, %v1049_v17 }
 0x52a   :  { %3037 = vmatpush3.bf16.msra.mxu1 %v899_v26  ;;  %3038 = vmatprep.mubr.msk.bf16.mxu1 %vm3341_vm1, %v3340_v15 }
 0x52b   :  { %3048 = vmatprep.subr.bf16.mxu1 %v3340_v15 }
 0x5fa   :  { %v767_v27 = vpop.f32.mrb[16].mxu0 }
 0x5fb   :  { %v819_v28 = vmul.f32 0.25, %v767_v27  ;;  %v3022_v29 = vpop.f32.mrb[17].mxu0 }
 0x5fc   :  { %v770_v30 = vpop.f32.mrb[18].mxu0  ;;  %v813_v31 = vpop.f32.mrb[24].mxu1 }
 0x5fd   :  { %v820_v32 = vmul.f32 0.25, %v813_v31  ;;  %v3023_v35 = vpop.f32.mrb[19].mxu0  ;;  %v3028_v37 = vpop.f32.mrb[25].mxu1  ;;  %v821_v38 = vadd.f32 %v3499_v6, %v819_v28 }
 0x5fe   :  { %v816_v39 = vpop.f32.mrb[26].mxu1 }
 0x5ff   :  { %v3029_v40 = vpop.f32.mrb[27].mxu1  ;;  %v823_v41 = vsel %vm402_vm4, %v821_v38, -inf  ;;  %v822_v42 = vadd.f32 %v3504_v11, %v820_v32 }
 0x600   :  { %824 = vmax.xlane.f32.xlu0 %v823_v41 }
 0x601   :  { %v826_v43 = vsel %vm402_vm4, %v822_v42, -inf }
 0x602   :  { %827 = vmax.xlane.f32.xlu1 %v826_v43  ;;  %v3242_v43 = vld [vmem:[%s3995_s6] sm:$0xff]  }
 0x68d   :  { %v825_v44 = vpop.xlane.xlu0 %824 }
 0x68e   :  { %v829_v45 = vsub.f32 %v821_v38, %v825_v44  ;;  %v3243_v44 = vld [vmem:[%s3995_s6 + $0x8] sm:$0xff]  }
 0x68f   :  { %v828_v46 = vpop.xlane.xlu1 %827 }
 0x690   :  { %v831_v47 = vmul.f32 1.442695, %v829_v45  ;;  %v830_v48 = vsub.f32 %v822_v42, %v828_v46 }
 0x692   :  { %3290 = vpow2.f32 %v831_v47  ;;  %v833_v50 = vmul.f32 1.442695, %v830_v48 }
 0x694   :  { %3292 = vpow2.f32 %v833_v50 }
 0x69c   :  { %v3291_v51 = vpop.eup %3290 }
 0x69d   :  { %v835_v54 = vsel %vm402_vm4, %v3291_v51, 0.0 }
 0x69e   :  { %v3293_v55 = vpop.eup %3292  ;;  %836 = vadd.xlane.f32.xlu0 %v835_v54  ;;  %v1081_v54 = vsub.s32 2, %v3612_v16 }
 0x69f   :  { %v838_v56 = vsel %vm402_vm4, %v3293_v55, 0.0 }
 0x6a0   :  { %839 = vadd.xlane.f32.xlu1 %v838_v56  ;;  %v1087_v56 = vsub.s32 3, %v3612_v16 }
 0x72b   :  { %v837_v57 = vpop.xlane.xlu0 %836 }
 0x72c   :  { %3294 = vrcp.f32 %v837_v57 }
 0x72d   :  { %v840_v58 = vpop.xlane.xlu1 %839 }
 0x72e   :  { %3296 = vrcp.f32 %v840_v58 }
 0x736   :  { %v3295_v36 = vpop.eup %3294 }
 0x737   :  { %v843_v59 = vmul.f32 %v3295_v36, %v3291_v51 }
 0x738   :  { %v3297_v60 = vpop.eup %3296 }
 0x739   :  { %v844_v62 = vmul.f32 %v3297_v60, %v3293_v55  ;;  %v845_v63 = vpack.c.bf16 %v843_v59, %v843_v59  ;;  %v1082_v55 = vrot.slane %v3618_v18, %v1081_v54 }
 0x73b   :  { %3033 = vmatmul.mubr.msk.bf16.vlgmr.msra.gmra.mrb[20].mxu0 %vm402_vm4, %v845_v63  ;;  %v846_v1 = vpack.c.bf16 %v844_v62, %v844_v62 }
 0x73c   :  { %3043 = vmatpush3.bf16.msra.mxu0 %v3241_v61  ;;  %3044 = vmatprep.mubr.msk.bf16.mxu0 %vm3341_vm1, %v3340_v15  ;;  %v1088_v61 = vrot.slane %v3618_v18, %v1087_v56 }
 0x73d   :  { %3039 = vmatmul.mubr.msk.bf16.vlgmr.msra.gmra.mrb[28].mxu1 %vm402_vm4, %v846_v1  ;;  %3054 = vmatprep.subr.bf16.mxu0 %v3340_v15 }
 0x73e   :  { %3049 = vmatpush3.bf16.msra.mxu1 %v3240_v0  ;;  %3050 = vmatprep.mubr.msk.bf16.mxu1 %vm3341_vm1, %v3340_v15 }
 0x73f   :  { %3062 = vmatprep.subr.bf16.mxu1 %v3340_v15 }
 0x745   :  { %3051 = vmatmul.mubr.msk.bf16.vlgmr.msra.gmra.mrb[32].mxu1 %vm305_vm2, %v522_v53 }
 0x746   :  { %3078 = vmatprep.mubr.msk.bf16.mxu1 %vm3341_vm1, %v3340_v15 }
 0x80e   :  { %v889_v2 = vpop.f32.mrb[20].mxu0 }
 0x80f   :  { %v3034_v3 = vpop.f32.mrb[21].mxu0 }
 0x810   :  { %v892_v4 = vpop.f32.mrb[22].mxu0  ;;  %v935_v5 = vpop.f32.mrb[28].mxu1  ;;  %v3245_v3 = vld [vmem:[%s3996_s8 + $0x8] sm:$0xff]  }
 0x811   :  { %v941_v7 = vpack.c.bf16 %v935_v5, %v889_v2  ;;  %v3035_v8 = vpop.f32.mrb[23].mxu0  ;;  %v3040_v9 = vpop.f32.mrb[29].mxu1  ;;  %v3244_v2 = vld [vmem:[%s3996_s8] sm:$0xff]   ;;  %v3246_v4 = vld [vmem:[%s3996_s8 + $0x10] sm:$0xff]   ;;  %v3247_v5 = vld [vmem:[%s3996_s8 + $0x18] sm:$0xff]  }
 0x812   :  { %v938_v10 = vpop.f32.mrb[30].mxu1  ;;  %3063 = vmatpush3.bf16.msra.mxu1 %v3244_v2  ;;  %v3249_v8 = vld [vmem:[%s3996_s8 + $0x28] sm:$0xff]   ;;  %v3250_v9 = vld [vmem:[%s3996_s8 + $0x30] sm:$0xff]  }
 0x813   :  { %v3041_v12 = vpop.f32.mrb[31].mxu1  ;;  %3045 = vmatmul.mubr.msk.bf16.vlgmr.msra.gmra.mrb[24].mxu0 %vm305_vm2, %v941_v7  ;;  %3064 = vmatprep.subr.bf16.mxu1 %v3340_v15  ;;  %v3248_v7 = vld [vmem:[%s3996_s8 + $0x20] sm:$0xff]   ;;  %v3251_v10 = vld [vmem:[%s3996_s8 + $0x38] sm:$0xff]  }
 0x814   :  { %3058 = vmatprep.mubr.msk.bf16.mxu0 %vm3341_vm1, %v3340_v15  ;;  %3055 = vmatpush3.bf16.msra.mxu0 %v3242_v43  ;;  %v2723_v12 = vld [vmem:[%s3997_s7] ss:$0 sm:$0xff] }
 0x815   :  { %3056 = vmatprep.subr.bf16.mxu0 %v3340_v15 }
 0x816   :  { %3065 = vmatpush3.bf16.msra.mxu1 %v3245_v3  ;;  %v3253_v3 = vld [vmem:[%s3989_s3 + $0x68] sm:$0xff]  }
 0x817   :  { %3066 = vmatprep.subr.bf16.mxu1 %v3340_v15 }
 0x818   :  { %v1038_v49 = vpop.f32.mrb[32].mxu1  ;;  %3057 = vmatpush3.bf16.msra.mxu0 %v3243_v44 }
 0x819   :  { %v3052_v52 = vpop.f32.mrb[33].mxu1  ;;  %3082 = vmatprep.subr.bf16.mxu0 %v3340_v15 }
 0x81a   :  { %v1041_v53 = vpop.f32.mrb[34].mxu1  ;;  %3067 = vmatpush3.bf16.msra.mxu1 %v3246_v4 }
 0x81b   :  { %v3053_v13 = vpop.f32.mrb[35].mxu1  ;;  %3068 = vmatprep.subr.bf16.mxu1 %v3340_v15 }
 0x81e   :  { %3069 = vmatpush3.bf16.msra.mxu1 %v3247_v5 }
 0x81f   :  { %3070 = vmatprep.subr.bf16.mxu1 %v3340_v15 }
 0x822   :  { %3071 = vmatpush3.bf16.msra.mxu1 %v3248_v7 }
 0x823   :  { %3072 = vmatprep.subr.bf16.mxu1 %v3340_v15 }
 0x826   :  { %3073 = vmatpush3.bf16.msra.mxu1 %v3249_v8 }
 0x827   :  { %3074 = vmatprep.subr.bf16.mxu1 %v3340_v15 }
 0x82a   :  { %3075 = vmatpush3.bf16.msra.mxu1 %v3250_v9 }
 0x82b   :  { %3076 = vmatprep.subr.bf16.mxu1 %v3340_v15 }
 0x82e   :  { %3077 = vmatpush3.bf16.msra.mxu1 %v3251_v10 }
 0x82f   :  { %3112 = vmatprep.subr.bf16.mxu1 %v3340_v15 }
 0x8e6   :  { %v988_v19 = vpop.f32.mrb[24].mxu0 }
 0x8e7   :  { %v1039_v20 = vadd.f32 %v1038_v49, %v988_v19  ;;  %v3046_v21 = vpop.f32.mrb[25].mxu0 }
 0x8e8   :  { %v991_v23 = vpop.f32.mrb[26].mxu0 }
 0x8e9   :  { %v1045_v24 = vadd.f32 %v1039_v20, %v3445_v33  ;;  %v1042_v25 = vadd.f32 %v1041_v53, %v991_v23  ;;  %v3047_v26 = vpop.f32.mrb[27].mxu0 }
 0x8eb   :  { %v1046_v27 = vadd.f32 %v1042_v25, %v3447_v34  ;;  %v1051_v28 = vadd.f32 %v1050_v22, %v1045_v24 }
 0x8ed   :  { %v1053_v29 = vsel %vm60_vm0, %v1051_v28, 0.0  ;;  %v1052_v30 = vadd.f32 %v1050_v22, %v1046_v27 }
 0x8ee   :  { %1054 = vadd.xlane.f32.xlu0 %v1053_v29 }
 0x8ef   :  { %v1056_v31 = vsel %vm60_vm0, %v1052_v30, 0.0 }
 0x8f0   :  { %1057 = vadd.xlane.f32.xlu1 %v1056_v31 }
 0x97b   :  { %v1055_v32 = vpop.xlane.xlu0 %1054 }
 0x97c   :  { %v1059_v35 = vmul.f32 0.03125, %v1055_v32 }
 0x97d   :  { %v1058_v37 = vpop.xlane.xlu1 %1057 }
 0x97e   :  { %v1061_v38 = vsub.f32 %v1051_v28, %v1059_v35  ;;  %v1060_v39 = vmul.f32 0.03125, %v1058_v37 }
 0x980   :  { %v1062_v40 = vsub.f32 %v1052_v30, %v1060_v39  ;;  %v1063_v41 = vmul.f32 %v1061_v38, %v1061_v38 }
 0x982   :  { %v1065_v33 = vsel %vm60_vm0, %v1063_v41, 0.0  ;;  %v1064_v42 = vmul.f32 %v1062_v40, %v1062_v40 }
 0x983   :  { %1066 = vadd.xlane.f32.xlu0 %v1065_v33  ;;  %v1196_v33 = vsub.s32 1, %v3612_v16 }
 0x984   :  { %v1068_v34 = vsel %vm60_vm0, %v1064_v42, 0.0 }
 0x985   :  { %1069 = vadd.xlane.f32.xlu1 %v1068_v34  ;;  %v1197_v42 = vrot.slane %v3618_v18, %v1196_v33 }
 0xa10   :  { %v1067_v45 = vpop.xlane.xlu0 %1066 }
 0xa11   :  { %v1071_v46 = vmul.f32 0.03125, %v1067_v45 }
 0xa12   :  { %v1070_v47 = vpop.xlane.xlu1 %1069 }
 0xa13   :  { %v1073_v48 = vadd.f32 1e-12, %v1071_v46  ;;  %v1072_v50 = vmul.f32 0.03125, %v1070_v47 }
 0xa15   :  { %3298 = vrsqrt.f32 %v1073_v48  ;;  %v1074_v51 = vadd.f32 1e-12, %v1072_v50 }
 0xa17   :  { %3300 = vrsqrt.f32 %v1074_v51 }
 0xa1f   :  { %v3299_v57 = vpop.eup %3298 }
 0xa20   :  { %v1077_v58 = vmul.f32 %v3299_v57, %v1061_v38 }
 0xa21   :  { %v3301_v36 = vpop.eup %3300 }
 0xa22   :  { %v1083_v59 = vmul.f32 %v1082_v55, %v1077_v58  ;;  %v1078_v60 = vmul.f32 %v3301_v36, %v1062_v40 }
 0xa24   :  { %v1084_v62 = vmul.f32 %v1082_v55, %v1078_v60  ;;  %v3645_v63 = vadd.f32 %v1088_v61, %v1083_v59 }
 0xa26   :  { %v3647_v0 = vadd.f32 %v1088_v61, %v1084_v62 }
 0xa28   :  { %v1091_v1 = vpack.c.bf16 %v3647_v0, %v3645_v63 }
 0xa2a   :  { %3059 = vmatmul.mubr.msk.bf16.vlgmr.msra.gmra.mrb[28].mxu0 %vm60_vm0, %v1091_v1 }
 0xa2b   :  { %3086 = vmatprep.mubr.msk.bf16.mxu0 %vm3341_vm1, %v3340_v15 }
 0xafd   :  { %v1152_v49 = vpop.f32.mrb[28].mxu0 }
 0xafe   :  { %v1153_v52 = vadd.f32 %v2723_v12, %v1152_v49  ;;  %v3060_v53 = vpop.f32.mrb[29].mxu0 }
 0xaff   :  { %v1155_v13 = vpop.f32.mrb[30].mxu0 }
 0xb00   :  { %v1161_v14 = vmul.f32 0.044715, %v1153_v52  ;;  %v1156_v19 = vadd.f32 %v2723_v12, %v1155_v13  ;;  %v3061_v20 = vpop.f32.mrb[31].mxu0  ;;  %v1159_v35 = vmul.f32 0.5, %v1153_v52  ;;  %v1317_v12 = vsub.s32 4, %v3612_v16 }
 0xb02   :  { %v1163_v21 = vmul.f32 %v1161_v14, %v1153_v52  ;;  %v1162_v22 = vmul.f32 0.044715, %v1156_v19  ;;  %v1160_v37 = vmul.f32 0.5, %v1156_v19  ;;  %v1318_v49 = vrot.slane %v3618_v18, %v1317_v12 }
 0xb04   :  { %v1165_v23 = vmul.f32 %v1163_v21, %v1153_v52  ;;  %v1164_v24 = vmul.f32 %v1162_v22, %v1156_v19 }
 0xb06   :  { %v1167_v25 = vadd.f32 %v1165_v23, %v1153_v52  ;;  %v1166_v26 = vmul.f32 %v1164_v24, %v1156_v19  ;;  %v1323_v52 = vsub.s32 5, %v3612_v16 }
 0xb08   :  { %v1169_v27 = vmul.f32 0.7978846, %v1167_v25  ;;  %v1168_v28 = vadd.f32 %v1166_v26, %v1156_v19  ;;  %v1324_v19 = vrot.slane %v3618_v18, %v1323_v52  ;;  %v3254_v25 = vld [vmem:[%s3989_s3 + $0x80] sm:$0xff]   ;;  %v3255_v18 = vld [vmem:[%s3989_s3 + $0x88] sm:$0xff]  }
 0xb0a   :  { %3302 = vtanh.f32 %v1169_v27  ;;  %v1170_v29 = vmul.f32 0.7978846, %v1168_v28  ;;  %v3256_v27 = vld [vmem:[%s3989_s3 + $0xa0] sm:$0xff]   ;;  %v3257_v28 = vld [vmem:[%s3989_s3 + $0xa8] sm:$0xff]  }
 0xb0c   :  { %3304 = vtanh.f32 %v1170_v29 }
 0xb14   :  { %v3303_v30 = vpop.eup %3302 }
 0xb15   :  { %v1173_v31 = vadd.f32 1.0, %v3303_v30 }
 0xb16   :  { %v3305_v32 = vpop.eup %3304 }
 0xb17   :  { %v1174_v38 = vadd.f32 1.0, %v3305_v32  ;;  %v1175_v39 = vmul.f32 %v1173_v31, %v1159_v35  ;;  %v2750_v35 = vld [vmem:[%s3991_s4 + $0x8] ss:$0 sm:$0xff] }
 0xb19   :  { %v1176_v40 = vmul.f32 %v1174_v38, %v1160_v37 }
 0xb1b   :  { %v1177_v41 = vpack.c.bf16 %v1176_v40, %v1175_v39 }
 0xb1d   :  { %3079 = vmatmul.mubr.bf16.vlgmr.msra.gmra.mrb[36].mxu1 %v1177_v41 }
 0xb1e   :  { %3114 = vmatprep.mubr.msk.bf16.mxu1 %vm3341_vm1, %v3340_v15 }
 0xbf0   :  { %v1280_v34 = vpop.f32.mrb[36].mxu1 }
 0xbf1   :  { %v1281_v43 = vadd.f32 %v1280_v34, %v1197_v42  ;;  %v3080_v44 = vpop.f32.mrb[37].mxu1 }
 0xbf2   :  { %v1283_v45 = vpop.f32.mrb[38].mxu1 }
 0xbf3   :  { %v1284_v46 = vadd.f32 %v1283_v45, %v1197_v42  ;;  %v3081_v47 = vpop.f32.mrb[39].mxu1  ;;  %v1287_v48 = vadd.f32 %v1281_v43, %v3645_v63  ;;  %v2741_v43 = vld [vmem:[%s3991_s4 + $0x6] ss:$0 sm:$0xff] }
 0xbf5   :  { %v1289_v50 = vsel %vm60_vm0, %v1287_v48, 0.0  ;;  %v1288_v51 = vadd.f32 %v1284_v46, %v3647_v0  ;;  %v3252_v0 = vld [vmem:[%s3989_s3 + $0x60] sm:$0xff]   ;;  %v2759_v46 = vld [vmem:[%s3991_s4 + $0xa] ss:$0 sm:$0xff] }
 0xbf6   :  { %1290 = vadd.xlane.f32.xlu0 %v1289_v50  ;;  %3083 = vmatpush3.bf16.msra.mxu0 %v3252_v0 }
 0xbf7   :  { %v1292_v55 = vsel %vm60_vm0, %v1288_v51, 0.0  ;;  %3084 = vmatprep.subr.bf16.mxu0 %v3340_v15 }
 0xbf8   :  { %1293 = vadd.xlane.f32.xlu1 %v1292_v55 }
 0xbfa   :  { %3085 = vmatpush3.bf16.msra.mxu0 %v3253_v3 }
 0xbfb   :  { %3090 = vmatprep.subr.bf16.mxu0 %v3340_v15 }
 0xc83   :  { %v1291_v57 = vpop.xlane.xlu0 %1290 }
 0xc84   :  { %v1295_v58 = vmul.f32 0.03125, %v1291_v57 }
 0xc85   :  { %v1294_v36 = vpop.xlane.xlu1 %1293 }
 0xc86   :  { %v1297_v59 = vsub.f32 %v1287_v48, %v1295_v58  ;;  %v1296_v60 = vmul.f32 0.03125, %v1294_v36 }
 0xc88   :  { %v1298_v61 = vsub.f32 %v1288_v51, %v1296_v60  ;;  %v1299_v62 = vmul.f32 %v1297_v59, %v1297_v59 }
 0xc8a   :  { %v1301_v1 = vsel %vm60_vm0, %v1299_v62, 0.0  ;;  %v1300_v2 = vmul.f32 %v1298_v61, %v1298_v61 }
 0xc8b   :  { %1302 = vadd.xlane.f32.xlu0 %v1301_v1 }
 0xc8c   :  { %v1304_v63 = vsel %vm60_vm0, %v1300_v2, 0.0 }
 0xc8d   :  { %1305 = vadd.xlane.f32.xlu1 %v1304_v63 }
 0xd18   :  { %v1303_v4 = vpop.xlane.xlu0 %1302 }
 0xd19   :  { %v1307_v5 = vmul.f32 0.03125, %v1303_v4 }
 0xd1a   :  { %v1306_v7 = vpop.xlane.xlu1 %1305 }
 0xd1b   :  { %v1309_v8 = vadd.f32 1e-12, %v1307_v5  ;;  %v1308_v9 = vmul.f32 0.03125, %v1306_v7 }
 0xd1d   :  { %3306 = vrsqrt.f32 %v1309_v8  ;;  %v1310_v10 = vadd.f32 1e-12, %v1308_v9 }
 0xd1f   :  { %3308 = vrsqrt.f32 %v1310_v10 }
 0xd27   :  { %v3307_v53 = vpop.eup %3306 }
 0xd28   :  { %v1313_v13 = vmul.f32 %v3307_v53, %v1297_v59 }
 0xd29   :  { %v3309_v14 = vpop.eup %3308 }
 0xd2a   :  { %v1319_v20 = vmul.f32 %v1318_v49, %v1313_v13  ;;  %v1314_v21 = vmul.f32 %v3309_v14, %v1298_v61 }
 0xd2c   :  { %v1320_v22 = vmul.f32 %v1318_v49, %v1314_v21  ;;  %v3717_v23 = vadd.f32 %v1324_v19, %v1319_v20 }
 0xd2e   :  { %v3719_v24 = vadd.f32 %v1324_v19, %v1320_v22 }
 0xd30   :  { %v3726_v26 = vpack.c.bf16 %v3719_v24, %v3717_v23 }
 0xd32   :  { %3087 = vmatmul.mubr.msk.bf16.vlgmr.msra.gmra.mrb[32].mxu0 %vm60_vm0, %v3726_v26 }
 0xd33   :  { %3091 = vmatpush3.bf16.msra.mxu0 %v3254_v25  ;;  %3094 = vmatprep.mubr.msk.bf16.mxu0 %vm3341_vm1, %v3340_v15 }
 0xd34   :  { %3092 = vmatprep.subr.bf16.mxu0 %v3340_v15 }
 0xd37   :  { %3093 = vmatpush3.bf16.msra.mxu0 %v3255_v18 }
 0xd38   :  { %3098 = vmatprep.subr.bf16.mxu0 %v3340_v15 }
 0xd3a   :  { %3095 = vmatmul.mubr.msk.bf16.vlgmr.msra.gmra.mrb[36].mxu0 %vm60_vm0, %v3726_v26 }
 0xd3b   :  { %3099 = vmatpush3.bf16.msra.mxu0 %v3256_v27  ;;  %3102 = vmatprep.mubr.msk.bf16.mxu0 %vm3341_vm1, %v3340_v15 }
 0xd3c   :  { %3100 = vmatprep.subr.bf16.mxu0 %v3340_v15 }
 0xd3f   :  { %3101 = vmatpush3.bf16.msra.mxu0 %v3257_v28 }
 0xd40   :  { %3106 = vmatprep.subr.bf16.mxu0 %v3340_v15 }
 0xd42   :  { %3103 = vmatmul.mubr.msk.bf16.vlgmr.msra.gmra.mrb[40].mxu0 %vm60_vm0, %v3726_v26 }
 0xd43   :  { %3108 = vmatprep.mubr.msk.bf16.mxu0 %vm3341_vm1, %v3340_v15 }
 0xe05   :  { %v1392_v29 = vpop.f32.mrb[32].mxu0 }
 0xe06   :  { %v3088_v30 = vpop.f32.mrb[33].mxu0  ;;  %v1393_v47 = vadd.f32 %v2741_v43, %v1392_v29 }
 0xe07   :  { %v1395_v31 = vpop.f32.mrb[34].mxu0 }
 0xe08   :  { %v3089_v32 = vpop.f32.mrb[35].mxu0  ;;  %v1396_v51 = vadd.f32 %v2741_v43, %v1395_v31  ;;  %v1531_v36 = vpack.c.bf16 %v1393_v47, %v1393_v47  ;;  %v3260_v43 = vld [vmem:[%s3989_s3 + $0x78] sm:$0xff]  }
 0xe0a   :  { %v1532_v62 = vpack.c.bf16 %v1396_v51, %v1396_v51 }
 0xe0d   :  { %v1458_v37 = vpop.f32.mrb[36].mxu0 }
 0xe0e   :  { %v1459_v38 = vadd.f32 %v2750_v35, %v1458_v37  ;;  %v3096_v39 = vpop.f32.mrb[37].mxu0 }
 0xe0f   :  { %v1461_v40 = vpop.f32.mrb[38].mxu0  ;;  %v3258_v39 = vld [vmem:[%s3989_s3 + $0x70] sm:$0xff]  }
 0xe10   :  { %v1533_v41 = vpack.c.bf16 %v1459_v38, %v1459_v38  ;;  %v1462_v42 = vadd.f32 %v2750_v35, %v1461_v40  ;;  %v3097_v34 = vpop.f32.mrb[39].mxu0 }
 0xe12   :  { %v1539_v44 = vsel %vm305_vm2, %v1533_v41, 0  ;;  %v1534_v45 = vpack.c.bf16 %v1462_v42, %v1462_v42  ;;  %v3259_v42 = vld [vmem:[%s3989_s3 + $0x90] sm:$0xff]  }
 0xe13   :  { %3107 = vmatpush3.bf16.xpose.msra.mxu0 %v1539_v44  ;;  %v3261_v44 = vld [vmem:[%s3989_s3 + $0x98] sm:$0xff]  }
 0xe14   :  { %v1585_v48 = vsel %vm305_vm2, %v1534_v45, 0  ;;  %3118 = vmatprep.subr.bf16.mxu0 %v3340_v15  ;;  %v3262_v45 = vld [vmem:[%s3989_s3 + $0xb0] sm:$0xff]  }
 0xe15   :  { %v1524_v50 = vpop.f32.mrb[40].mxu0  ;;  %3113 = vmatpush3.bf16.xpose.msra.mxu1 %v1585_v48 }
 0xe16   :  { %v1525_v55 = vadd.f32 %v2759_v46, %v1524_v50  ;;  %v3104_v57 = vpop.f32.mrb[41].mxu0  ;;  %3124 = vmatprep.subr.bf16.mxu1 %v3340_v15 }
 0xe17   :  { %v1527_v58 = vpop.f32.mrb[42].mxu0 }
 0xe18   :  { %v1655_v59 = vpack.c.bf16 %v1525_v55, %v1525_v55  ;;  %v1528_v60 = vadd.f32 %v2759_v46, %v1527_v58  ;;  %v3105_v61 = vpop.f32.mrb[43].mxu0  ;;  %v3263_v46 = vld [vmem:[%s3989_s3 + $0xb8] sm:$0xff]  }
 0xe1a   :  { %v1661_v1 = vsel %vm432_vm3, %v1655_v59, 0  ;;  %v1656_v2 = vpack.c.bf16 %v1528_v60, %v1528_v60  ;;  %3109 = vmatmul.mubr.msk.bf16.vlgmr.msra.gmra.mrb[44].mxu0 %vm305_vm2, %v1531_v36 }
 0xe1b   :  { %3119 = vmatpush3.bf16.msra.mxu0 %v1661_v1  ;;  %3120 = vmatprep.mubr.msk.bf16.mxu0 %vm3341_vm1, %v3340_v15 }
 0xe1c   :  { %v1707_v63 = vsel %vm432_vm3, %v1656_v2, 0  ;;  %3115 = vmatmul.mubr.msk.bf16.vlgmr.msra.gmra.mrb[40].mxu1 %vm305_vm2, %v1532_v62  ;;  %3130 = vmatprep.subr.bf16.mxu0 %v3340_v15 }
 0xe1d   :  { %3125 = vmatpush3.bf16.msra.mxu1 %v1707_v63  ;;  %3126 = vmatprep.mubr.msk.bf16.mxu1 %vm3341_vm1, %v3340_v15 }
 0xe1e   :  { %3138 = vmatprep.subr.bf16.mxu1 %v3340_v15 }
 0xeed   :  { %v1575_v0 = vpop.f32.mrb[44].mxu0 }
 0xeee   :  { %v1627_v3 = vmul.f32 0.25, %v1575_v0  ;;  %v3110_v4 = vpop.f32.mrb[45].mxu0 }
 0xeef   :  { %v1578_v5 = vpop.f32.mrb[46].mxu0  ;;  %v1621_v7 = vpop.f32.mrb[40].mxu1 }
 0xef0   :  { %v1628_v8 = vmul.f32 0.25, %v1621_v7  ;;  %v3111_v9 = vpop.f32.mrb[47].mxu0  ;;  %v3116_v10 = vpop.f32.mrb[41].mxu1  ;;  %v1629_v49 = vadd.f32 %v3499_v6, %v1627_v3 }
 0xef1   :  { %v1624_v53 = vpop.f32.mrb[42].mxu1  ;;  %v2792_v9 = vld [vmem:[%s3991_s4 + $0xb] ss:$0 sm:$0xff] }
 0xef2   :  { %v3117_v13 = vpop.f32.mrb[43].mxu1  ;;  %v1631_v14 = vsel %vm402_vm4, %v1629_v49, -inf  ;;  %v1630_v19 = vadd.f32 %v3504_v11, %v1628_v8  ;;  %v2774_v8 = vld [vmem:[%s3991_s4 + $0x7] ss:$0 sm:$0xff] }
 0xef3   :  { %1632 = vmax.xlane.f32.xlu1 %v1631_v14 }
 0xef4   :  { %v1634_v20 = vsel %vm402_vm4, %v1630_v19, -inf }
 0xef5   :  { %1635 = vmax.xlane.f32.xlu0 %v1634_v20 }
 0xf80   :  { %v1633_v21 = vpop.xlane.xlu1 %1632 }
 0xf81   :  { %v1637_v22 = vsub.f32 %v1629_v49, %v1633_v21 }
 0xf82   :  { %v1636_v25 = vpop.xlane.xlu0 %1635 }
 0xf83   :  { %v1639_v18 = vmul.f32 1.442695, %v1637_v22  ;;  %v1638_v27 = vsub.f32 %v1630_v19, %v1636_v25 }
 0xf85   :  { %3310 = vpow2.f32 %v1639_v18  ;;  %v1641_v28 = vmul.f32 1.442695, %v1638_v27 }
 0xf87   :  { %3312 = vpow2.f32 %v1641_v28 }
 0xf8f   :  { %v3311_v29 = vpop.eup %3310 }
 0xf90   :  { %v1643_v6 = vsel %vm402_vm4, %v3311_v29, 0.0 }
 0xf91   :  { %v3313_v30 = vpop.eup %3312  ;;  %1644 = vadd.xlane.f32.xlu1 %v1643_v6 }
 0xf92   :  { %v1646_v31 = vsel %vm402_vm4, %v3313_v30, 0.0 }
 0xf93   :  { %1647 = vadd.xlane.f32.xlu0 %v1646_v31 }
0x101e   :  { %v1645_v11 = vpop.xlane.xlu1 %1644 }
0x101f   :  { %3314 = vrcp.f32 %v1645_v11 }
0x1020   :  { %v1648_v32 = vpop.xlane.xlu0 %1647 }
0x1021   :  { %3316 = vrcp.f32 %v1648_v32 }
0x1029   :  { %v3315_v35 = vpop.eup %3314 }
0x102a   :  { %v1651_v37 = vmul.f32 %v3315_v35, %v3311_v29 }
0x102b   :  { %v3317_v38 = vpop.eup %3316 }
0x102c   :  { %v1652_v40 = vmul.f32 %v3317_v38, %v3313_v30  ;;  %v1653_v41 = vpack.c.bf16 %v1651_v37, %v1651_v37 }
0x102e   :  { %3121 = vmatmul.mubr.msk.bf16.vlgmr.msra.gmra.mrb[48].mxu0 %vm402_vm4, %v1653_v41  ;;  %v1654_v34 = vpack.c.bf16 %v1652_v40, %v1652_v40 }
0x102f   :  { %3131 = vmatpush3.bf16.msra.mxu0 %v3258_v39  ;;  %3134 = vmatprep.mubr.msk.bf16.mxu0 %vm3341_vm1, %v3340_v15 }
0x1030   :  { %3127 = vmatmul.mubr.msk.bf16.vlgmr.msra.gmra.mrb[44].mxu1 %vm402_vm4, %v1654_v34  ;;  %3132 = vmatprep.subr.bf16.mxu0 %v3340_v15 }
0x1031   :  { %3139 = vmatpush3.bf16.msra.mxu1 %v3259_v42  ;;  %3142 = vmatprep.mubr.msk.bf16.mxu1 %vm3341_vm1, %v3340_v15  ;;  %v3338_v42 = vld [vmem:[%s3992_s1] ss:$0 sm:$0xff] }
0x1032   :  { %3140 = vmatprep.subr.bf16.mxu1 %v3340_v15 }
0x1033   :  { %3133 = vmatpush3.bf16.msra.mxu0 %v3260_v43 }
0x1034   :  { %3146 = vmatprep.subr.bf16.mxu0 %v3340_v15 }
0x1035   :  { %3141 = vmatpush3.bf16.msra.mxu1 %v3261_v44 }
0x1036   :  { %3135 = vmatmul.mubr.msk.bf16.vlgmr.msra.gmra.mrb[52].mxu0 %vm60_vm0, %v3726_v26  ;;  %3154 = vmatprep.subr.bf16.mxu1 %v3340_v15 }
0x1037   :  { %3147 = vmatpush3.bf16.msra.mxu0 %v3262_v45  ;;  %3150 = vmatprep.mubr.msk.bf16.mxu0 %vm3341_vm1, %v3340_v15 }
0x1038   :  { %3143 = vmatmul.mubr.msk.bf16.vlgmr.msra.gmra.mrb[48].mxu1 %vm60_vm0, %v3726_v26  ;;  %3148 = vmatprep.subr.bf16.mxu0 %v3340_v15 }
0x1039   :  { %3156 = vmatprep.mubr.msk.bf16.mxu1 %vm3341_vm1, %v3340_v15 }
0x103b   :  { %3149 = vmatpush3.bf16.msra.mxu0 %v3263_v46  ;;  %v3339_v46 = vld [vmem:[%s3992_s1 + $0x1] ss:$0 sm:$0xff] }
0x103c   :  { %3160 = vmatprep.subr.bf16.mxu0 %v3340_v15 }
0x103e   :  { %3151 = vmatmul.mubr.msk.bf16.vlgmr.msra.gmra.mrb[56].mxu0 %vm60_vm0, %v3726_v26  ;;  %v2783_v26 = vld [vmem:[%s3991_s4 + $0x9] ss:$0 sm:$0xff] }
0x103f   :  { %3162 = vmatprep.mubr.msk.bf16.mxu0 %vm3341_vm1, %v3340_v15 }
0x1101   :  { %v3824_v47 = vpop.f32.mrb[48].mxu0 }
0x1102   :  { %v3122_v48 = vpop.f32.mrb[49].mxu0 }
0x1103   :  { %v1700_v50 = vpop.f32.mrb[50].mxu0  ;;  %v3826_v51 = vpop.f32.mrb[44].mxu1 }
0x1104   :  { %v1749_v55 = vpack.c.bf16 %v3826_v51, %v3824_v47  ;;  %v3123_v57 = vpop.f32.mrb[51].mxu0  ;;  %v3128_v58 = vpop.f32.mrb[45].mxu1 }
0x1105   :  { %v1746_v36 = vpop.f32.mrb[46].mxu1 }
0x1106   :  { %v3129_v59 = vpop.f32.mrb[47].mxu1 }
0x1109   :  { %v1812_v60 = vpop.f32.mrb[52].mxu0 }
0x110a   :  { %v3136_v61 = vpop.f32.mrb[53].mxu0  ;;  %v1813_v13 = vadd.f32 %v2774_v8, %v1812_v60 }
0x110b   :  { %v1815_v62 = vpop.f32.mrb[54].mxu0  ;;  %v1878_v1 = vpop.f32.mrb[48].mxu1 }
0x110c   :  { %v1879_v2 = vadd.f32 %v2783_v26, %v1878_v1  ;;  %v3137_v63 = vpop.f32.mrb[55].mxu0  ;;  %v3144_v0 = vpop.f32.mrb[49].mxu1  ;;  %v1816_v22 = vadd.f32 %v2774_v8, %v1815_v62  ;;  %v1951_v28 = vpack.c.bf16 %v1813_v13, %v1813_v13 }
0x110d   :  { %v1881_v3 = vpop.f32.mrb[50].mxu1 }
0x110e   :  { %v1953_v4 = vpack.c.bf16 %v1879_v2, %v1879_v2  ;;  %v1882_v5 = vadd.f32 %v2783_v26, %v1881_v3  ;;  %v3145_v7 = vpop.f32.mrb[51].mxu1  ;;  %v1952_v6 = vpack.c.bf16 %v1816_v22, %v1816_v22 }
0x110f   :  { %v3265_v7 = vld [vmem:[%s3993_s5 + $0x18] sm:$0xff]  }
0x1110   :  { %v1959_v10 = vsel %vm305_vm2, %v1953_v4, 0  ;;  %v1954_v49 = vpack.c.bf16 %v1882_v5, %v1882_v5 }
0x1111   :  { %v1944_v53 = vpop.f32.mrb[56].mxu0  ;;  %3155 = vmatpush3.bf16.xpose.msra.mxu1 %v1959_v10  ;;  %v3264_v10 = vld [vmem:[%s3993_s5 + $0x10] sm:$0xff]  }
0x1112   :  { %v2005_v14 = vsel %vm305_vm2, %v1954_v49, 0  ;;  %v1945_v19 = vadd.f32 %v2792_v9, %v1944_v53  ;;  %v3152_v20 = vpop.f32.mrb[57].mxu0  ;;  %3166 = vmatprep.subr.bf16.mxu1 %v3340_v15 }
0x1113   :  { %v1947_v21 = vpop.f32.mrb[58].mxu0  ;;  %3161 = vmatpush3.bf16.xpose.msra.mxu0 %v2005_v14 }
0x1114   :  { %v2075_v25 = vpack.c.bf16 %v1945_v19, %v1945_v19  ;;  %v1948_v18 = vadd.f32 %v2792_v9, %v1947_v21  ;;  %v3153_v27 = vpop.f32.mrb[59].mxu0  ;;  %3172 = vmatprep.subr.bf16.mxu0 %v3340_v15 }
0x1116   :  { %v2076_v29 = vpack.c.bf16 %v1948_v18, %v1948_v18  ;;  %v2081_v30 = vsel %vm432_vm3, %v2075_v25, 0 }
0x1118   :  { %3157 = vmatmul.mubr.msk.bf16.vlgmr.msra.gmra.mrb[52].mxu1 %vm305_vm2, %v1951_v28  ;;  %v2127_v31 = vsel %vm432_vm3, %v2076_v29, 0  ;;  %v3889_v28 = vld [vmem:[%s3994_s9 + $0x8] sm:$0x3f] }
0x1119   :  { %3167 = vmatpush3.bf16.msra.mxu1 %v2081_v30  ;;  %3168 = vmatprep.mubr.msk.bf16.mxu1 %vm3341_vm1, %v3340_v15 }
0x111a   :  { %3163 = vmatmul.mubr.msk.bf16.vlgmr.msra.gmra.mrb[60].mxu0 %vm305_vm2, %v1952_v6  ;;  %3178 = vmatprep.subr.bf16.mxu1 %v3340_v15 }
0x111b   :  { %3173 = vmatpush3.bf16.msra.mxu0 %v2127_v31  ;;  %3174 = vmatprep.mubr.msk.bf16.mxu0 %vm3341_vm1, %v3340_v15  ;;  %v2278_v31 = vrot.slane %v3889_v28, %v1049_v17 }
0x111c   :  { %3184 = vmatprep.subr.bf16.mxu0 %v3340_v15 }
0x11eb   :  { %v1995_v11 = vpop.f32.mrb[52].mxu1 }
0x11ec   :  { %v2047_v32 = vmul.f32 0.25, %v1995_v11  ;;  %v3158_v35 = vpop.f32.mrb[53].mxu1 }
0x11ed   :  { %v1998_v37 = vpop.f32.mrb[54].mxu1  ;;  %v2041_v38 = vpop.f32.mrb[60].mxu0 }
0x11ee   :  { %v2048_v39 = vmul.f32 0.25, %v2041_v38  ;;  %v3159_v40 = vpop.f32.mrb[55].mxu1  ;;  %v3164_v41 = vpop.f32.mrb[61].mxu0  ;;  %v2049_v34 = vadd.f32 %v3338_v42, %v2047_v32 }
0x11ef   :  { %v2044_v43 = vpop.f32.mrb[62].mxu0 }
0x11f0   :  { %v3165_v44 = vpop.f32.mrb[63].mxu0  ;;  %v2051_v45 = vsel %vm402_vm4, %v2049_v34, -inf  ;;  %v2050_v48 = vadd.f32 %v3339_v46, %v2048_v39 }
0x11f1   :  { %2052 = vmax.xlane.f32.xlu0 %v2051_v45 }
0x11f2   :  { %v2054_v50 = vsel %vm402_vm4, %v2050_v48, -inf }
0x11f3   :  { %2055 = vmax.xlane.f32.xlu1 %v2054_v50 }
0x127e   :  { %v2053_v57 = vpop.xlane.xlu0 %2052 }
0x127f   :  { %v2057_v58 = vsub.f32 %v2049_v34, %v2053_v57  ;;  %v3266_v57 = vld [vmem:[%s3995_s6 + $0x10] sm:$0xff]  }
0x1280   :  { %v2056_v36 = vpop.xlane.xlu1 %2055 }
0x1281   :  { %v2059_v59 = vmul.f32 1.442695, %v2057_v58  ;;  %v2058_v60 = vsub.f32 %v2050_v48, %v2056_v36  ;;  %v3267_v58 = vld [vmem:[%s3995_s6 + $0x18] sm:$0xff]  }
0x1283   :  { %3318 = vpow2.f32 %v2059_v59  ;;  %v2061_v26 = vmul.f32 1.442695, %v2058_v60 }
0x1285   :  { %3320 = vpow2.f32 %v2061_v26 }
0x128d   :  { %v3319_v61 = vpop.eup %3318 }
0x128e   :  { %v2063_v62 = vsel %vm402_vm4, %v3319_v61, 0.0 }
0x128f   :  { %v3321_v1 = vpop.eup %3320  ;;  %2064 = vadd.xlane.f32.xlu0 %v2063_v62 }
0x1290   :  { %v2066_v2 = vsel %vm402_vm4, %v3321_v1, 0.0 }
0x1291   :  { %2067 = vadd.xlane.f32.xlu1 %v2066_v2 }
0x131c   :  { %v2065_v63 = vpop.xlane.xlu0 %2064 }
0x131d   :  { %3322 = vrcp.f32 %v2065_v63 }
0x131e   :  { %v2068_v0 = vpop.xlane.xlu1 %2067 }
0x131f   :  { %3324 = vrcp.f32 %v2068_v0 }
0x1327   :  { %v3323_v3 = vpop.eup %3322 }
0x1328   :  { %v2071_v4 = vmul.f32 %v3323_v3, %v3319_v61 }
0x1329   :  { %v3325_v5 = vpop.eup %3324 }
0x132a   :  { %v2072_v8 = vmul.f32 %v3325_v5, %v3321_v1  ;;  %v2073_v9 = vpack.c.bf16 %v2071_v4, %v2071_v4  ;;  %v2310_v1 = vrot.slane %v3889_v28, %v1081_v54  ;;  %v2316_v5 = vrot.slane %v3889_v28, %v1087_v56  ;;  %v3268_v54 = vld [vmem:[%s3996_s8 + $0x40] sm:$0xff]   ;;  %v3269_v56 = vld [vmem:[%s3996_s8 + $0x48] sm:$0xff]  }
0x132c   :  { %3169 = vmatmul.mubr.msk.bf16.vlgmr.msra.gmra.mrb[56].mxu1 %vm402_vm4, %v2073_v9  ;;  %v2074_v49 = vpack.c.bf16 %v2072_v8, %v2072_v8 }
0x132d   :  { %3179 = vmatpush3.bf16.msra.mxu1 %v3265_v7  ;;  %3180 = vmatprep.mubr.msk.bf16.mxu1 %vm3341_vm1, %v3340_v15 }
0x132e   :  { %3175 = vmatmul.mubr.msk.bf16.vlgmr.msra.gmra.mrb[64].mxu0 %vm402_vm4, %v2074_v49  ;;  %3190 = vmatprep.subr.bf16.mxu1 %v3340_v15  ;;  %v3270_v49 = vld [vmem:[%s3996_s8 + $0x50] sm:$0xff]  }
0x132f   :  { %3185 = vmatpush3.bf16.msra.mxu0 %v3264_v10  ;;  %3186 = vmatprep.mubr.msk.bf16.mxu0 %vm3341_vm1, %v3340_v15 }
0x1330   :  { %3198 = vmatprep.subr.bf16.mxu0 %v3340_v15 }
0x1336   :  { %3187 = vmatmul.mubr.msk.bf16.vlgmr.msra.gmra.mrb[68].mxu0 %vm305_vm2, %v1749_v55 }
0x1337   :  { %3214 = vmatprep.mubr.msk.bf16.mxu0 %vm3341_vm1, %v3340_v15  ;;  %3199 = vmatpush3.bf16.msra.mxu0 %v3268_v54 }
0x1338   :  { %3200 = vmatprep.subr.bf16.mxu0 %v3340_v15 }
0x133b   :  { %3201 = vmatpush3.bf16.msra.mxu0 %v3269_v56 }
0x133c   :  { %3202 = vmatprep.subr.bf16.mxu0 %v3340_v15 }
0x133f   :  { %3203 = vmatpush3.bf16.msra.mxu0 %v3270_v49 }
0x1340   :  { %3204 = vmatprep.subr.bf16.mxu0 %v3340_v15 }
0x13ff   :  { %v2117_v53 = vpop.f32.mrb[56].mxu1 }
0x1400   :  { %v3170_v13 = vpop.f32.mrb[57].mxu1 }
0x1401   :  { %v2120_v14 = vpop.f32.mrb[58].mxu1  ;;  %v2163_v19 = vpop.f32.mrb[64].mxu0  ;;  %v3272_v13 = vld [vmem:[%s3996_s8 + $0x60] sm:$0xff]  }
0x1402   :  { %v2169_v20 = vpack.c.bf16 %v2163_v19, %v2117_v53  ;;  %v3171_v21 = vpop.f32.mrb[59].mxu1  ;;  %v3176_v22 = vpop.f32.mrb[65].mxu0  ;;  %v3271_v53 = vld [vmem:[%s3996_s8 + $0x58] sm:$0xff]   ;;  %v3273_v14 = vld [vmem:[%s3996_s8 + $0x68] sm:$0xff]   ;;  %v3274_v19 = vld [vmem:[%s3996_s8 + $0x70] sm:$0xff]  }
0x1403   :  { %v2166_v25 = vpop.f32.mrb[66].mxu0  ;;  %3205 = vmatpush3.bf16.msra.mxu0 %v3271_v53  ;;  %v2811_v21 = vld [vmem:[%s3997_s7 + $0x1] ss:$0 sm:$0xff] }
0x1404   :  { %v3177_v18 = vpop.f32.mrb[67].mxu0  ;;  %3181 = vmatmul.mubr.msk.bf16.vlgmr.msra.gmra.mrb[60].mxu1 %vm305_vm2, %v2169_v20  ;;  %3206 = vmatprep.subr.bf16.mxu0 %v3340_v15  ;;  %v3275_v20 = vld [vmem:[%s3996_s8 + $0x78] sm:$0xff]  }
0x1405   :  { %3194 = vmatprep.mubr.msk.bf16.mxu1 %vm3341_vm1, %v3340_v15  ;;  %3191 = vmatpush3.bf16.msra.mxu1 %v3266_v57 }
0x1406   :  { %3192 = vmatprep.subr.bf16.mxu1 %v3340_v15 }
0x1407   :  { %3207 = vmatpush3.bf16.msra.mxu0 %v3272_v13  ;;  %v2549_v13 = vrot.slane %v3889_v28, %v1317_v12 }
0x1408   :  { %3208 = vmatprep.subr.bf16.mxu0 %v3340_v15 }
0x1409   :  { %v2266_v47 = vpop.f32.mrb[68].mxu0  ;;  %3193 = vmatpush3.bf16.msra.mxu1 %v3267_v58 }
0x140a   :  { %v3188_v51 = vpop.f32.mrb[69].mxu0  ;;  %3218 = vmatprep.subr.bf16.mxu1 %v3340_v15 }
0x140b   :  { %v2269_v55 = vpop.f32.mrb[70].mxu0  ;;  %3209 = vmatpush3.bf16.msra.mxu0 %v3273_v14 }
0x140c   :  { %v3189_v27 = vpop.f32.mrb[71].mxu0  ;;  %3210 = vmatprep.subr.bf16.mxu0 %v3340_v15 }
0x140f   :  { %3211 = vmatpush3.bf16.msra.mxu0 %v3274_v19  ;;  %v2555_v19 = vrot.slane %v3889_v28, %v1323_v52 }
0x1410   :  { %3212 = vmatprep.subr.bf16.mxu0 %v3340_v15 }
0x1413   :  { %3213 = vmatpush3.bf16.msra.mxu0 %v3275_v20 }
0x14d7   :  { %v2216_v29 = vpop.f32.mrb[60].mxu1 }
0x14d8   :  { %v2267_v6 = vadd.f32 %v2266_v47, %v2216_v29  ;;  %v3182_v30 = vpop.f32.mrb[61].mxu1 }
0x14d9   :  { %v2219_v11 = vpop.f32.mrb[62].mxu1 }
0x14da   :  { %v2273_v32 = vadd.f32 %v2267_v6, %v3717_v23  ;;  %v2270_v35 = vadd.f32 %v2269_v55, %v2219_v11  ;;  %v3183_v37 = vpop.f32.mrb[63].mxu1 }
0x14dc   :  { %v2274_v38 = vadd.f32 %v2270_v35, %v3719_v24  ;;  %v2279_v39 = vadd.f32 %v2278_v31, %v2273_v32 }
0x14de   :  { %v2281_v40 = vsel %vm60_vm0, %v2279_v39, 0.0  ;;  %v2280_v41 = vadd.f32 %v2278_v31, %v2274_v38 }
0x14df   :  { %2282 = vadd.xlane.f32.xlu0 %v2281_v40 }
0x14e0   :  { %v2284_v42 = vsel %vm60_vm0, %v2280_v41, 0.0 }
0x14e1   :  { %2285 = vadd.xlane.f32.xlu1 %v2284_v42 }
0x156c   :  { %v2283_v34 = vpop.xlane.xlu0 %2282 }
0x156d   :  { %v2287_v43 = vmul.f32 0.03125, %v2283_v34 }
0x156e   :  { %v2286_v44 = vpop.xlane.xlu1 %2285 }
0x156f   :  { %v2289_v45 = vsub.f32 %v2279_v39, %v2287_v43  ;;  %v2288_v17 = vmul.f32 0.03125, %v2286_v44 }
0x1571   :  { %v2290_v46 = vsub.f32 %v2280_v41, %v2288_v17  ;;  %v2291_v48 = vmul.f32 %v2289_v45, %v2289_v45 }
0x1573   :  { %v2293_v23 = vsel %vm60_vm0, %v2291_v48, 0.0  ;;  %v2292_v50 = vmul.f32 %v2290_v46, %v2290_v46 }
0x1574   :  { %2294 = vadd.xlane.f32.xlu0 %v2293_v23 }
0x1575   :  { %v2296_v24 = vsel %vm60_vm0, %v2292_v50, 0.0 }
0x1576   :  { %2297 = vadd.xlane.f32.xlu1 %v2296_v24 }
0x1601   :  { %v2295_v36 = vpop.xlane.xlu0 %2294 }
0x1602   :  { %v2299_v59 = vmul.f32 0.03125, %v2295_v36 }
0x1603   :  { %v2298_v60 = vpop.xlane.xlu1 %2297 }
0x1604   :  { %v2301_v26 = vadd.f32 1e-12, %v2299_v59  ;;  %v2300_v61 = vmul.f32 0.03125, %v2298_v60 }
0x1606   :  { %3326 = vrsqrt.f32 %v2301_v26  ;;  %v2302_v62 = vadd.f32 1e-12, %v2300_v61 }
0x1608   :  { %3328 = vrsqrt.f32 %v2302_v62 }
0x1610   :  { %v3327_v2 = vpop.eup %3326 }
0x1611   :  { %v2305_v63 = vmul.f32 %v3327_v2, %v2289_v45 }
0x1612   :  { %v3329_v0 = vpop.eup %3328 }
0x1613   :  { %v2311_v3 = vmul.f32 %v2310_v1, %v2305_v63  ;;  %v2306_v4 = vmul.f32 %v3329_v0, %v2290_v46  ;;  %v2428_v46 = vrot.slane %v3889_v28, %v1196_v33 }
0x1615   :  { %v2312_v7 = vmul.f32 %v2310_v1, %v2306_v4  ;;  %v3914_v8 = vadd.f32 %v2316_v5, %v2311_v3 }
0x1617   :  { %v3916_v9 = vadd.f32 %v2316_v5, %v2312_v7  ;;  %v3276_v7 = vld [vmem:[%s3998_s10] sm:$0xff]  }
0x1619   :  { %v2319_v10 = vpack.c.bf16 %v3916_v9, %v3914_v8 }
0x161b   :  { %3195 = vmatmul.mubr.msk.bf16.vlgmr.msra.gmra.mrb[64].mxu1 %vm60_vm0, %v2319_v10 }
0x161c   :  { %3222 = vmatprep.mubr.msk.bf16.mxu1 %vm3341_vm1, %v3340_v15  ;;  %3219 = vmatpush3.bf16.msra.mxu1 %v3276_v7 }
0x161d   :  { %3220 = vmatprep.subr.bf16.mxu1 %v3340_v15 }
0x16ee   :  { %v2382_v22 = vpop.f32.mrb[64].mxu1 }
0x16ef   :  { %v2383_v25 = vadd.f32 %v2811_v21, %v2382_v22  ;;  %v3196_v18 = vpop.f32.mrb[65].mxu1 }
0x16f0   :  { %v2385_v47 = vpop.f32.mrb[66].mxu1 }
0x16f1   :  { %v2391_v51 = vmul.f32 0.044715, %v2383_v25  ;;  %v2386_v55 = vadd.f32 %v2811_v21, %v2385_v47  ;;  %v3197_v27 = vpop.f32.mrb[67].mxu1  ;;  %v2389_v42 = vmul.f32 0.5, %v2383_v25 }
0x16f3   :  { %v2393_v29 = vmul.f32 %v2391_v51, %v2383_v25  ;;  %v2392_v6 = vmul.f32 0.044715, %v2386_v55  ;;  %v2390_v34 = vmul.f32 0.5, %v2386_v55 }
0x16f5   :  { %v2395_v30 = vmul.f32 %v2393_v29, %v2383_v25  ;;  %v2394_v31 = vmul.f32 %v2392_v6, %v2386_v55 }
0x16f7   :  { %v2397_v11 = vadd.f32 %v2395_v30, %v2383_v25  ;;  %v2396_v32 = vmul.f32 %v2394_v31, %v2386_v55 }
0x16f9   :  { %v2399_v35 = vmul.f32 0.7978846, %v2397_v11  ;;  %v2398_v37 = vadd.f32 %v2396_v32, %v2386_v55 }
0x16fb   :  { %3330 = vtanh.f32 %v2399_v35  ;;  %v2400_v38 = vmul.f32 0.7978846, %v2398_v37 }
0x16fd   :  { %3332 = vtanh.f32 %v2400_v38 }
0x1705   :  { %v3331_v39 = vpop.eup %3330 }
0x1706   :  { %v2403_v40 = vadd.f32 1.0, %v3331_v39 }
0x1707   :  { %v3333_v41 = vpop.eup %3332 }
0x1708   :  { %v2404_v43 = vadd.f32 1.0, %v3333_v41  ;;  %v2405_v44 = vmul.f32 %v2403_v40, %v2389_v42 }
0x170a   :  { %v2406_v45 = vmul.f32 %v2404_v43, %v2390_v34 }
0x170c   :  { %v2407_v17 = vpack.c.bf16 %v2406_v45, %v2405_v44  ;;  %v2839_v44 = vld [vmem:[%s3999_s11] ss:$0 sm:$0xff] }
0x170e   :  { %3215 = vmatmul.mubr.bf16.vlgmr.msra.gmra.mrb[72].mxu0 %v2407_v17 }
0x17e1   :  { %v2511_v48 = vpop.f32.mrb[72].mxu0 }
0x17e2   :  { %v2512_v23 = vadd.f32 %v2511_v48, %v2428_v46  ;;  %v3216_v50 = vpop.f32.mrb[73].mxu0 }
0x17e3   :  { %v2514_v24 = vpop.f32.mrb[74].mxu0 }
0x17e4   :  { %v2515_v57 = vadd.f32 %v2514_v24, %v2428_v46  ;;  %v3217_v58 = vpop.f32.mrb[75].mxu0  ;;  %v2518_v36 = vadd.f32 %v2512_v23, %v3914_v8  ;;  %v3277_v8 = vld [vmem:[%s3998_s10 + $0x8] sm:$0xff]  }
0x17e5   :  { %3221 = vmatpush3.bf16.msra.mxu1 %v3277_v8 }
0x17e6   :  { %v2520_v59 = vsel %vm60_vm0, %v2518_v36, 0.0  ;;  %v2519_v60 = vadd.f32 %v2515_v57, %v3916_v9 }
0x17e7   :  { %2521 = vadd.xlane.f32.xlu0 %v2520_v59 }
0x17e8   :  { %v2523_v26 = vsel %vm60_vm0, %v2519_v60, 0.0 }
0x17e9   :  { %2524 = vadd.xlane.f32.xlu1 %v2523_v26 }
0x1874   :  { %v2522_v61 = vpop.xlane.xlu0 %2521 }
0x1875   :  { %v2526_v62 = vmul.f32 0.03125, %v2522_v61 }
0x1876   :  { %v2525_v1 = vpop.xlane.xlu1 %2524 }
0x1877   :  { %v2528_v33 = vsub.f32 %v2518_v36, %v2526_v62  ;;  %v2527_v2 = vmul.f32 0.03125, %v2525_v1 }
0x1879   :  { %v2529_v63 = vsub.f32 %v2519_v60, %v2527_v2  ;;  %v2530_v0 = vmul.f32 %v2528_v33, %v2528_v33 }
0x187b   :  { %v2532_v3 = vsel %vm60_vm0, %v2530_v0, 0.0  ;;  %v2531_v4 = vmul.f32 %v2529_v63, %v2529_v63 }
0x187c   :  { %2533 = vadd.xlane.f32.xlu0 %v2532_v3 }
0x187d   :  { %v2535_v5 = vsel %vm60_vm0, %v2531_v4, 0.0 }
0x187e   :  { %2536 = vadd.xlane.f32.xlu1 %v2535_v5 }
0x1909   :  { %v2534_v9 = vpop.xlane.xlu0 %2533 }
0x190a   :  { %v2538_v10 = vmul.f32 0.03125, %v2534_v9 }
0x190b   :  { %v2537_v54 = vpop.xlane.xlu1 %2536 }
0x190c   :  { %v2540_v56 = vadd.f32 1e-12, %v2538_v10  ;;  %v2539_v49 = vmul.f32 0.03125, %v2537_v54 }
0x190e   :  { %3334 = vrsqrt.f32 %v2540_v56  ;;  %v2541_v53 = vadd.f32 1e-12, %v2539_v49 }
0x1910   :  { %3336 = vrsqrt.f32 %v2541_v53 }
0x1918   :  { %v3335_v14 = vpop.eup %3334 }
0x1919   :  { %v2544_v20 = vmul.f32 %v3335_v14, %v2528_v33 }
0x191a   :  { %v3337_v15 = vpop.eup %3336 }
0x191b   :  { %v2550_v21 = vmul.f32 %v2549_v13, %v2544_v20  ;;  %v2545_v22 = vmul.f32 %v3337_v15, %v2529_v63 }
0x191d   :  { %v2556_v25 = vadd.f32 %v2555_v19, %v2550_v21  ;;  %v2551_v18 = vmul.f32 %v2549_v13, %v2545_v22 }
0x191f   :  { %v2558_v47 = vsel %vm60_vm0, %v2556_v25, 0.0  ;;  %v2557_v51 = vadd.f32 %v2555_v19, %v2551_v18 }
0x1920   :  { %v2559_v55 = vrot.slane %v2558_v47, 4 }
0x1921   :  { %v2565_v27 = vsel %vm60_vm0, %v2557_v51, 0.0 }
0x1922   :  { %v2560_v29 = vadd.f32 %v2559_v55, %v2558_v47  ;;  %v2566_v6 = vrot.slane %v2565_v27, 4 }
0x1924   :  { %v2561_v12 = vrot.slane %v2560_v29, 2  ;;  %v2567_v30 = vadd.f32 %v2566_v6, %v2565_v27 }
0x1926   :  { %v2568_v31 = vrot.slane %v2567_v30, 2  ;;  %v2562_v16 = vadd.f32 %v2561_v12, %v2560_v29 }
0x1928   :  { %v2563_v11 = vrot.slane %v2562_v16, 1  ;;  %v2569_v52 = vadd.f32 %v2568_v31, %v2567_v30 }
0x192a   :  { %v2564_v28 = vadd.f32 %v2563_v11, %v2562_v16  ;;  %v2570_v32 = vrot.slane %v2569_v52, 1 }
0x192c   :  { %v2571_v35 = vadd.f32 %v2570_v32, %v2569_v52  ;;  %v2573_v37 = vmul.f32 0.125, %v2564_v28 }
0x192e   :  { %v2574_v38 = vmul.f32 0.125, %v2571_v35  ;;  %v2575_v39 = vpack.c.bf16 %v2573_v37, %v2573_v37 }
0x1930   :  { %v2576_v40 = vpack.c.bf16 %v2574_v38, %v2574_v38  ;;  %v2590_v41 = vunpack.c.l.b16 %v2575_v39 }
0x1932   :  { %v2591_v42 = vunpack.c.l.b16 %v2576_v40 }
0x1934   :  { %v2593_v34 = vsel %vm2592_vm5, %v2591_v42, %v2590_v41 }
0x1935   :  { %v2594_v43 = vpack.c.b16 %v2593_v34, %v2593_v34 }
0x1937   :  { %3223 = vmatmul.mubr.msk.bf16.vlgmr.msra.gmra.mrb[68].mxu1 %vm60_vm0, %v2594_v43 }
0x1a0a   :  { %v2644_v45 = vpop.f32.mrb[68].mxu1 }
0x1a0b   :  { %v2645_v17 = vadd.f32 %v2839_v44, %v2644_v45  ;;  %v3224_v46 = vpop.f32.mrb[69].mxu1 }
0x1a0c   :  { %v2647_v48 = vpop.f32.mrb[70].mxu1 }
0x1a0d   :  { %2651 = vst.msk [vmem:[%s4000_s12] sm:$0x3] %vm2650_vm6, %v2645_v17  ;;  %v3225_v23 = vpop.f32.mrb[71].mxu1 }

</bundles_post_ra>
